<compile_context>
chip_gen: v6e
topology: v6e:2x2x1
jax: 0.10.0
libtpu: 0.0.40
codegen_flags: <defaults>
</compile_context>

<pallas_src>
import functools

import jax
import jax.numpy as jnp
import numpy as np
from jax import lax
from jax.experimental import pallas as pl
from jax.experimental.pallas import tpu as pltpu

BN_EPS = 1e-5


# --------------------------- Pallas kernels ---------------------------------

def _conv3x3_stats(img, w_ref, y_ref, st_ref, not_left, not_right, *, W2):
    """3x3 'same' conv as 3 accumulating (Cout,3C)@(3C,HW) dots + BN stats.

    img: (C, HW) bf16, spatial flattened row-major (HW = H2*W2).
    Zero padding trick: pad (W2+1) zero lanes on both sides; tap (ky, kx) is
    then the contiguous lane slice starting at ky*W2+kx.  The only wrong reads
    are horizontal row wraps (kx=0 at x=0, kx=2 at x=W2-1), which are masked
    with the precomputed not_left / not_right lane masks -> exact zero padding.
    Conv bias is intentionally omitted: it cancels through train-mode BN.
    """
    C, HW = img.shape
    zero = jnp.zeros((C, W2 + 1), img.dtype)
    padded = jnp.concatenate([zero, img, zero], axis=1)      # (C, HW + 2*W2 + 2)

    acc = None
    for ky in range(3):
        taps = []
        for kx in range(3):
            start = ky * W2 + kx
            t = padded[:, start:start + HW]                  # (C, HW) bf16
            if kx == 0:
                t = jnp.where(not_left, t, jnp.zeros_like(t))
            elif kx == 2:
                t = jnp.where(not_right, t, jnp.zeros_like(t))
            taps.append(t)
        slab = jnp.concatenate(taps, axis=0)                 # (3C, HW) bf16
        part = jnp.dot(w_ref[ky], slab, preferred_element_type=jnp.float32)
        acc = part if acc is None else acc + part            # (Cout, HW) f32

    y_ref[0] = acc.astype(y_ref.dtype)
    # per-image BatchNorm partial statistics (summed over the batch in wrapper).
    # TODO(synk): (Cout, 2) stats store is lane-sparse; negligible at this size.
    st_ref[0] = jnp.concatenate(
        [jnp.sum(acc, axis=1, keepdims=True),
         jnp.sum(acc * acc, axis=1, keepdims=True)], axis=1)  # (Cout, 2)


def conv1_kernel(x_ref, skip_ref, wup_ref, bup_ref, scat_ref, masks_ref, w1_ref,
                 y_ref, st_ref, *, W2, Cout):
    """Fused ConvTranspose2d(k2,s2) + pixel shuffle + cat(up, skip) + conv3x3."""
    m = masks_ref[...]
    not_left, not_right = m[0:1, :] > 0.5, m[1:2, :] > 0.5

    # --- upconv: 4 channel-mix dots + 4 scatter dots against 0/1 matrices ----
    x = x_ref[0].astype(jnp.bfloat16)                        # (Cin, H*W)
    up = None
    for d in range(4):                                       # d = 2*di + dj
        yd = jnp.dot(wup_ref[d], x, preferred_element_type=jnp.float32)
        sd = jnp.dot(yd.astype(jnp.bfloat16), scat_ref[d],
                     preferred_element_type=jnp.float32)     # (Cout, H2*W2)
        up = sd if up is None else up + sd
    up = up + bup_ref[...]                                   # (Cout, 1) bias

    # --- torch.cat([up, skip], dim=1): registers/VMEM only, no HBM concat ----
    img = jnp.concatenate(
        [up.astype(jnp.bfloat16), skip_ref[0].astype(jnp.bfloat16)], axis=0)
    _conv3x3_stats(img, w1_ref, y_ref, st_ref, not_left, not_right, W2=W2)


def conv2_kernel(y1_ref, sc_ref, sh_ref, masks_ref, w2_ref, y_ref, st_ref, *, W2):
    """ConvBlock1's BatchNorm + ReLU folded into this kernel's input read."""
    m = masks_ref[...]
    not_left, not_right = m[0:1, :] > 0.5, m[1:2, :] > 0.5
    a = y1_ref[0].astype(jnp.float32) * sc_ref[...] + sh_ref[...]
    img = jnp.maximum(a, 0.0).astype(jnp.bfloat16)
    _conv3x3_stats(img, w2_ref, y_ref, st_ref, not_left, not_right, W2=W2)


def bn_relu_kernel(x_ref, sc_ref, sh_ref, o_ref):
    """Final BatchNorm + ReLU on lane-dense (Cout, HW) tiles (bf16 in, f32 out)."""
    o_ref[0] = jnp.maximum(
        x_ref[0].astype(jnp.float32) * sc_ref[...] + sh_ref[...], 0.0)


# --------------------------- wrapper -----------------------------------------

def _bn_scale_shift(stats, gamma, beta, count):
    """stats: (N, C, 2) per-image [sum, sum_sq] -> train-mode BN affine."""
    s = jnp.sum(stats, axis=0)                   # (C, 2)
    mean = s[:, 0] / count
    # TODO(synk): E[x^2]-E[x]^2 can cancel for huge N*HW; fine at these sizes.
    var = s[:, 1] / count - mean * mean          # biased variance (PyTorch train)
    scale = gamma * lax.rsqrt(var + BN_EPS)
    shift = beta - mean * scale
    return scale.reshape(-1, 1), shift.reshape(-1, 1)


def _pixel_shuffle_scatter(H, W):
    """(4, H*W, 4*H*W) 0/1 matrices: S[2*di+dj] scatters the (di,dj) sub-image of
    the k2s2 transposed conv onto the flattened (2H, 2W) output grid (exact in
    bf16: entries are 0/1 and each output pixel has exactly one source)."""
    HW_in, W2 = H * W, 2 * W
    q = np.arange(HW_in)
    i, j = q // W, q % W
    s = np.zeros((4, HW_in, 4 * HW_in), np.float32)
    for di in range(2):
        for dj in range(2):
            p = (2 * i + di) * W2 + (2 * j + dj)
            s[2 * di + dj, q, p] = 1.0
    return jnp.asarray(s, jnp.bfloat16)


def _border_masks(H2, W2):
    """(2, H2*W2) f32: row 0 = 'not leftmost column', row 1 = 'not rightmost'."""
    col = np.arange(H2 * W2) % W2
    return jnp.asarray(np.stack([(col != 0), (col != W2 - 1)]).astype(np.float32))


@jax.jit
def decoder_block(x_nchw, skip_nchw, params):
    N, Cin, H, W = x_nchw.shape
    _, Cskip, H2, W2 = skip_nchw.shape
    Cout = params['up_w'].shape[1]
    Cin1 = Cout + Cskip
    HW_in, HW = H * W, H2 * W2
    par = pltpu.CompilerParams(dimension_semantics=("parallel",),
                               vmem_limit_bytes=32 * 1024 * 1024)

    # trace-time constants (tiny)
    scat = _pixel_shuffle_scatter(H, W)                      # (4, HW_in, HW) bf16
    masks = _border_masks(H2, W2)                            # (2, HW) f32

    # weight re-layouts (tiny, one-time)
    w_up = (params['up_w'].transpose(2, 3, 1, 0)             # (di, dj, co, ci)
            .reshape(4, Cout, Cin).astype(jnp.bfloat16))
    b_up = params['up_b'].reshape(Cout, 1)
    # conv weights ky-major: (3, Cout, 3*Cin), columns ordered (kx, ci).
    w1 = (params['c1_w'].transpose(2, 0, 3, 1)
          .reshape(3, Cout, 3 * Cin1).astype(jnp.bfloat16))
    w2 = (params['c2_w'].transpose(2, 0, 3, 1)
          .reshape(3, Cout, 3 * Cout).astype(jnp.bfloat16))
    # NOTE: c1_b / c2_b are unused: a per-channel constant added before
    # train-mode BatchNorm cancels exactly (valid while running stats are
    # not materialized -- see TODO at the top of the file).

    # --- kernel 1: upconv + pixel-shuffle + cat + conv3x3 + BN1 stats --------
    y1, st1 = pl.pallas_call(
        functools.partial(conv1_kernel, W2=W2, Cout=Cout),
        grid=(N,),
        in_specs=[pl.BlockSpec((1, Cin, HW_in), lambda n: (n, 0, 0)),
                  pl.BlockSpec((1, Cskip, HW), lambda n: (n, 0, 0)),
                  pl.BlockSpec((4, Cout, Cin), lambda n: (0, 0, 0)),
                  pl.BlockSpec((Cout, 1), lambda n: (0, 0)),
                  pl.BlockSpec((4, HW_in, HW), lambda n: (0, 0, 0)),
                  pl.BlockSpec((2, HW), lambda n: (0, 0)),
                  pl.BlockSpec((3, Cout, 3 * Cin1), lambda n: (0, 0, 0))],
        out_specs=[pl.BlockSpec((1, Cout, HW), lambda n: (n, 0, 0)),
                   pl.BlockSpec((1, Cout, 2), lambda n: (n, 0, 0))],
        out_shape=[jax.ShapeDtypeStruct((N, Cout, HW), jnp.bfloat16),
                   jax.ShapeDtypeStruct((N, Cout, 2), jnp.float32)],
        compiler_params=par,
    )(x_nchw.reshape(N, Cin, HW_in), skip_nchw.reshape(N, Cskip, HW),
      w_up, b_up, scat, masks, w1)
    sc1, sh1 = _bn_scale_shift(st1, params['c1_g'], params['c1_beta'], N * HW)

    # --- kernel 2: (BN1 + ReLU folded into read) + conv3x3 + BN2 stats -------
    y2, st2 = pl.pallas_call(
        functools.partial(conv2_kernel, W2=W2),
        grid=(N,),
        in_specs=[pl.BlockSpec((1, Cout, HW), lambda n: (n, 0, 0)),
                  pl.BlockSpec((Cout, 1), lambda n: (0, 0)),
                  pl.BlockSpec((Cout, 1), lambda n: (0, 0)),
                  pl.BlockSpec((2, HW), lambda n: (0, 0)),
                  pl.BlockSpec((3, Cout, 3 * Cout), lambda n: (0, 0, 0))],
        out_specs=[pl.BlockSpec((1, Cout, HW), lambda n: (n, 0, 0)),
                   pl.BlockSpec((1, Cout, 2), lambda n: (n, 0, 0))],
        out_shape=[jax.ShapeDtypeStruct((N, Cout, HW), jnp.bfloat16),
                   jax.ShapeDtypeStruct((N, Cout, 2), jnp.float32)],
        compiler_params=par,
    )(y1, sc1, sh1, masks, w2)
    sc2, sh2 = _bn_scale_shift(st2, params['c2_g'], params['c2_beta'], N * HW)

    # --- kernel 3: final BN2 + ReLU -------------------------------------------
    out = pl.pallas_call(
        bn_relu_kernel,
        grid=(N,),
        in_specs=[pl.BlockSpec((1, Cout, HW), lambda n: (n, 0, 0)),
                  pl.BlockSpec((Cout, 1), lambda n: (0, 0)),
                  pl.BlockSpec((Cout, 1), lambda n: (0, 0))],
        out_specs=pl.BlockSpec((1, Cout, HW), lambda n: (n, 0, 0)),
        out_shape=jax.ShapeDtypeStruct((N, Cout, HW), jnp.float32),
        compiler_params=par,
    )(y2, sc2, sh2)
    return out.reshape(N, Cout, H2, W2)


# --------------------------- pure-JAX reference -------------------------------

def decoder_block_ref(x, skip, p):
    N, Cin, H, W = x.shape
    Cout = p['up_w'].shape[1]
    y = jnp.einsum('ncij,cokl->noikjl', x, p['up_w'])
    y = y.reshape(N, Cout, 2 * H, 2 * W) + p['up_b'][None, :, None, None]
    z = jnp.concatenate([y, skip], axis=1)

    def conv_block(z, w, b, g, beta):
        c = lax.conv_general_dilated(z, w, (1, 1), ((1, 1), (1, 1)),
                                     dimension_numbers=('NCHW', 'OIHW', 'NCHW'))
        c = c + b[None, :, None, None]
        mean = c.mean(axis=(0, 2, 3), keepdims=True)
        var = ((c - mean) ** 2).mean(axis=(0, 2, 3), keepdims=True)
        cn = (c - mean) * lax.rsqrt(var + BN_EPS)
        return jnp.maximum(cn * g[None, :, None, None] + beta[None, :, None, None],
                           0.0)

    z = conv_block(z, p['c1_w'], p['c1_b'], p['c1_g'], p['c1_beta'])
    z = conv_block(z, p['c2_w'], p['c2_b'], p['c2_g'], p['c2_beta'])
    return z


# --------------------------- main ---------------------------------------------

if __name__ == "__main__":
    # Note: the PyTorch module only runs when in_channels == out_channels
    # (cat gives out+skip channels but conv1 expects in+skip channels).
    N, Cin, Cskip, Cout = 2, 4, 4, 4
    Hin = Win = 8

    key = jax.random.PRNGKey(0)
    ks = jax.random.split(key, 8)
    params = {
        # ConvTranspose2d weight in PyTorch layout (in, out, kH, kW)
        'up_w': 0.1 * jax.random.normal(ks[0], (Cin, Cout, 2, 2), jnp.float32),
        'up_b': 0.1 * jax.random.normal(ks[1], (Cout,), jnp.float32),
        # Conv2d weights in PyTorch layout (out, in, kH, kW)
        'c1_w': 0.1 * jax.random.normal(ks[2], (Cout, Cout + Cskip, 3, 3), jnp.float32),
        'c1_b': 0.1 * jax.random.normal(ks[3], (Cout,), jnp.float32),
        'c1_g': jnp.ones((Cout,), jnp.float32),       # BN gamma (PyTorch default)
        'c1_beta': jnp.zeros((Cout,), jnp.float32),   # BN beta
        'c2_w': 0.1 * jax.random.normal(ks[4], (Cout, Cout, 3, 3), jnp.float32),
        'c2_b': 0.1 * jax.random.normal(ks[5], (Cout,), jnp.float32),
        'c2_g': jnp.ones((Cout,), jnp.float32),
        'c2_beta': jnp.zeros((Cout,), jnp.float32),
    }

    x = jax.random.normal(ks[6], (N, Cin, Hin, Win), jnp.float32)
    skip = jax.random.normal(ks[7], (N, Cskip, 2 * Hin, 2 * Win), jnp.float32)

    out = jax.block_until_ready(decoder_block(x, skip, params))
    ref = jax.block_until_ready(decoder_block_ref(x, skip, params))

    assert out.shape == (N, Cout, 2 * Hin, 2 * Win), out.shape
    # tolerance accounts for bf16 MXU operands and bf16 inter-stage tensors
    # (f32 accumulation and f32 BN statistics).
    np.testing.assert_allclose(np.asarray(out), np.asarray(ref),
                               rtol=3e-2, atol=3e-2)
    print("KERNEL_OK")
</pallas_src>

<mosaic_0001>
module attributes {stable_mosaic.version = 11 : i64} {
  func.func @conv1_kernel(%arg0: i32, %arg1: memref<1x4x64xf32, #tpu.memory_space<vmem>>, %arg2: memref<1x4x256xf32, #tpu.memory_space<vmem>>, %arg3: memref<4x4x4xbf16, #tpu.memory_space<vmem>>, %arg4: memref<4x1xf32, #tpu.memory_space<vmem>>, %arg5: memref<4x64x256xbf16, #tpu.memory_space<vmem>>, %arg6: memref<2x256xf32, #tpu.memory_space<vmem>>, %arg7: memref<3x4x24xbf16, #tpu.memory_space<vmem>>, %arg8: memref<1x4x256xbf16, #tpu.memory_space<vmem>>, %arg9: memref<1x4x2xf32, #tpu.memory_space<vmem>>) attributes {dimension_semantics = [#tpu.dimension_semantics<parallel>], iteration_bounds = array<i64: 2>, scalar_prefetch = 0 : i64, scratch_operands = 0 : i64, tpu.core_type = #tpu.core_type<tc>, window_params = [{transform_indices = @transform_0, window_bounds = array<i64: 1, 4, 64>}, {transform_indices = @transform_1, window_bounds = array<i64: 1, 4, 256>}, {pipeline_mode = #tpu.pipeline_mode<synchronous>, transform_indices = @transform_2, window_bounds = array<i64: 4, 4, 4>}, {pipeline_mode = #tpu.pipeline_mode<synchronous>, transform_indices = @transform_3, window_bounds = array<i64: 4, 1>}, {pipeline_mode = #tpu.pipeline_mode<synchronous>, transform_indices = @transform_4, window_bounds = array<i64: 4, 64, 256>}, {pipeline_mode = #tpu.pipeline_mode<synchronous>, transform_indices = @transform_5, window_bounds = array<i64: 2, 256>}, {pipeline_mode = #tpu.pipeline_mode<synchronous>, transform_indices = @transform_6, window_bounds = array<i64: 3, 4, 24>}, {transform_indices = @transform_7, window_bounds = array<i64: 1, 4, 256>}, {transform_indices = @transform_8, window_bounds = array<i64: 1, 4, 2>}]} {
    %c0 = arith.constant 0 : index
    %c0_0 = arith.constant 0 : index
    %0 = vector.load %arg6[%c0, %c0_0] : memref<2x256xf32, #tpu.memory_space<vmem>>, vector<2x256xf32>
    %1 = vector.extract_strided_slice %0 {offsets = [0, 0], sizes = [1, 256], strides = [1, 1]} : vector<2x256xf32> to vector<1x256xf32>
    %cst = arith.constant 5.000000e-01 : f32
    %2 = vector.broadcast %cst : f32 to vector<1x256xf32>
    %3 = arith.cmpf ogt, %1, %2 : vector<1x256xf32>
    %4 = vector.extract_strided_slice %0 {offsets = [1, 0], sizes = [1, 256], strides = [1, 1]} : vector<2x256xf32> to vector<1x256xf32>
    %cst_1 = arith.constant 5.000000e-01 : f32
    %5 = vector.broadcast %cst_1 : f32 to vector<1x256xf32>
    %6 = arith.cmpf ogt, %4, %5 : vector<1x256xf32>
    %c0_2 = arith.constant 0 : index
    %c0_3 = arith.constant 0 : index
    %c0_4 = arith.constant 0 : index
    %7 = vector.load %arg1[%c0_2, %c0_3, %c0_4] : memref<1x4x64xf32, #tpu.memory_space<vmem>>, vector<1x4x64xf32>
    %8 = vector.shape_cast %7 : vector<1x4x64xf32> to vector<4x64xf32>
    %9 = arith.truncf %8 : vector<4x64xf32> to vector<4x64xbf16>
    %c0_5 = arith.constant 0 : index
    %c0_6 = arith.constant 0 : index
    %c0_7 = arith.constant 0 : index
    %10 = vector.load %arg3[%c0_5, %c0_6, %c0_7] : memref<4x4x4xbf16, #tpu.memory_space<vmem>>, vector<1x4x4xbf16>
    %11 = vector.shape_cast %10 : vector<1x4x4xbf16> to vector<4x4xbf16>
    %cst_8 = arith.constant dense<0.000000e+00> : vector<4x64xf32>
    %12 = tpu.matmul %11, %9, %cst_8 {dimension_numbers = #tpu.dot_dimension_numbers<[1], [0], [0], [1], [0, 0, 1, 1], [], []>} : vector<4x4xbf16>, vector<4x64xbf16>, vector<4x64xf32> -> vector<4x64xf32>
    %13 = arith.truncf %12 : vector<4x64xf32> to vector<4x64xbf16>
    %c0_9 = arith.constant 0 : index
    %c0_10 = arith.constant 0 : index
    %c0_11 = arith.constant 0 : index
    %14 = vector.load %arg5[%c0_9, %c0_10, %c0_11] : memref<4x64x256xbf16, #tpu.memory_space<vmem>>, vector<1x64x256xbf16>
    %15 = vector.shape_cast %14 : vector<1x64x256xbf16> to vector<64x256xbf16>
    %cst_12 = arith.constant dense<0.000000e+00> : vector<4x256xf32>
    %16 = tpu.matmul %13, %15, %cst_12 {dimension_numbers = #tpu.dot_dimension_numbers<[1], [0], [0], [1], [0, 0, 1, 1], [], []>} : vector<4x64xbf16>, vector<64x256xbf16>, vector<4x256xf32> -> vector<4x256xf32>
    %c1 = arith.constant 1 : index
    %c0_13 = arith.constant 0 : index
    %c0_14 = arith.constant 0 : index
    %17 = vector.load %arg3[%c1, %c0_13, %c0_14] : memref<4x4x4xbf16, #tpu.memory_space<vmem>>, vector<1x4x4xbf16>
    %18 = vector.shape_cast %17 : vector<1x4x4xbf16> to vector<4x4xbf16>
    %cst_15 = arith.constant dense<0.000000e+00> : vector<4x64xf32>
    %19 = tpu.matmul %18, %9, %cst_15 {dimension_numbers = #tpu.dot_dimension_numbers<[1], [0], [0], [1], [0, 0, 1, 1], [], []>} : vector<4x4xbf16>, vector<4x64xbf16>, vector<4x64xf32> -> vector<4x64xf32>
    %20 = arith.truncf %19 : vector<4x64xf32> to vector<4x64xbf16>
    %c1_16 = arith.constant 1 : index
    %c0_17 = arith.constant 0 : index
    %c0_18 = arith.constant 0 : index
    %21 = vector.load %arg5[%c1_16, %c0_17, %c0_18] : memref<4x64x256xbf16, #tpu.memory_space<vmem>>, vector<1x64x256xbf16>
    %22 = vector.shape_cast %21 : vector<1x64x256xbf16> to vector<64x256xbf16>
    %cst_19 = arith.constant dense<0.000000e+00> : vector<4x256xf32>
    %23 = tpu.matmul %20, %22, %cst_19 {dimension_numbers = #tpu.dot_dimension_numbers<[1], [0], [0], [1], [0, 0, 1, 1], [], []>} : vector<4x64xbf16>, vector<64x256xbf16>, vector<4x256xf32> -> vector<4x256xf32>
    %24 = arith.addf %16, %23 : vector<4x256xf32>
    %c2 = arith.constant 2 : index
    %c0_20 = arith.constant 0 : index
    %c0_21 = arith.constant 0 : index
    %25 = vector.load %arg3[%c2, %c0_20, %c0_21] : memref<4x4x4xbf16, #tpu.memory_space<vmem>>, vector<1x4x4xbf16>
    %26 = vector.shape_cast %25 : vector<1x4x4xbf16> to vector<4x4xbf16>
    %cst_22 = arith.constant dense<0.000000e+00> : vector<4x64xf32>
    %27 = tpu.matmul %26, %9, %cst_22 {dimension_numbers = #tpu.dot_dimension_numbers<[1], [0], [0], [1], [0, 0, 1, 1], [], []>} : vector<4x4xbf16>, vector<4x64xbf16>, vector<4x64xf32> -> vector<4x64xf32>
    %28 = arith.truncf %27 : vector<4x64xf32> to vector<4x64xbf16>
    %c2_23 = arith.constant 2 : index
    %c0_24 = arith.constant 0 : index
    %c0_25 = arith.constant 0 : index
    %29 = vector.load %arg5[%c2_23, %c0_24, %c0_25] : memref<4x64x256xbf16, #tpu.memory_space<vmem>>, vector<1x64x256xbf16>
    %30 = vector.shape_cast %29 : vector<1x64x256xbf16> to vector<64x256xbf16>
    %cst_26 = arith.constant dense<0.000000e+00> : vector<4x256xf32>
    %31 = tpu.matmul %28, %30, %cst_26 {dimension_numbers = #tpu.dot_dimension_numbers<[1], [0], [0], [1], [0, 0, 1, 1], [], []>} : vector<4x64xbf16>, vector<64x256xbf16>, vector<4x256xf32> -> vector<4x256xf32>
    %32 = arith.addf %24, %31 : vector<4x256xf32>
    %c3 = arith.constant 3 : index
    %c0_27 = arith.constant 0 : index
    %c0_28 = arith.constant 0 : index
    %33 = vector.load %arg3[%c3, %c0_27, %c0_28] : memref<4x4x4xbf16, #tpu.memory_space<vmem>>, vector<1x4x4xbf16>
    %34 = vector.shape_cast %33 : vector<1x4x4xbf16> to vector<4x4xbf16>
    %cst_29 = arith.constant dense<0.000000e+00> : vector<4x64xf32>
    %35 = tpu.matmul %34, %9, %cst_29 {dimension_numbers = #tpu.dot_dimension_numbers<[1], [0], [0], [1], [0, 0, 1, 1], [], []>} : vector<4x4xbf16>, vector<4x64xbf16>, vector<4x64xf32> -> vector<4x64xf32>
    %36 = arith.truncf %35 : vector<4x64xf32> to vector<4x64xbf16>
    %c3_30 = arith.constant 3 : index
    %c0_31 = arith.constant 0 : index
    %c0_32 = arith.constant 0 : index
    %37 = vector.load %arg5[%c3_30, %c0_31, %c0_32] : memref<4x64x256xbf16, #tpu.memory_space<vmem>>, vector<1x64x256xbf16>
    %38 = vector.shape_cast %37 : vector<1x64x256xbf16> to vector<64x256xbf16>
    %cst_33 = arith.constant dense<0.000000e+00> : vector<4x256xf32>
    %39 = tpu.matmul %36, %38, %cst_33 {dimension_numbers = #tpu.dot_dimension_numbers<[1], [0], [0], [1], [0, 0, 1, 1], [], []>} : vector<4x64xbf16>, vector<64x256xbf16>, vector<4x256xf32> -> vector<4x256xf32>
    %40 = arith.addf %32, %39 : vector<4x256xf32>
    %c0_34 = arith.constant 0 : index
    %c0_35 = arith.constant 0 : index
    %41 = vector.load %arg4[%c0_34, %c0_35] : memref<4x1xf32, #tpu.memory_space<vmem>>, vector<4x1xf32>
    %42 = vector.broadcast %41 : vector<4x1xf32> to vector<4x256xf32>
    %43 = arith.addf %40, %42 : vector<4x256xf32>
    %44 = arith.truncf %43 : vector<4x256xf32> to vector<4x256xbf16>
    %c0_36 = arith.constant 0 : index
    %c0_37 = arith.constant 0 : index
    %c0_38 = arith.constant 0 : index
    %45 = vector.load %arg2[%c0_36, %c0_37, %c0_38] : memref<1x4x256xf32, #tpu.memory_space<vmem>>, vector<1x4x256xf32>
    %46 = vector.shape_cast %45 : vector<1x4x256xf32> to vector<4x256xf32>
    %47 = arith.truncf %46 : vector<4x256xf32> to vector<4x256xbf16>
    %48 = tpu.concatenate %44, %47 in 0 : vector<4x256xbf16>, vector<4x256xbf16> -> vector<8x256xbf16>
    %cst_39 = arith.constant 0.000000e+00 : bf16
    %49 = vector.broadcast %cst_39 : bf16 to vector<8x17xbf16>
    %50 = tpu.concatenate %49, %48, %49 in 1 : vector<8x17xbf16>, vector<8x256xbf16>, vector<8x17xbf16> -> vector<8x290xbf16>
    %51 = vector.extract_strided_slice %50 {offsets = [0, 0], sizes = [8, 256], strides = [1, 1]} : vector<8x290xbf16> to vector<8x256xbf16>
    %cst_40 = arith.constant 0.000000e+00 : bf16
    %52 = vector.broadcast %cst_40 : bf16 to vector<8x256xbf16>
    %53 = vector.shape_cast %3 : vector<1x256xi1> to vector<1x256xi1>
    %54 = vector.broadcast %53 : vector<1x256xi1> to vector<8x256xi1>
    %55 = arith.select %54, %51, %52 : vector<8x256xi1>, vector<8x256xbf16>
    %56 = vector.extract_strided_slice %50 {offsets = [0, 1], sizes = [8, 256], strides = [1, 1]} : vector<8x290xbf16> to vector<8x256xbf16>
    %57 = vector.extract_strided_slice %50 {offsets = [0, 2], sizes = [8, 256], strides = [1, 1]} : vector<8x290xbf16> to vector<8x256xbf16>
    %cst_41 = arith.constant 0.000000e+00 : bf16
    %58 = vector.broadcast %cst_41 : bf16 to vector<8x256xbf16>
    %59 = vector.shape_cast %6 : vector<1x256xi1> to vector<1x256xi1>
    %60 = vector.broadcast %59 : vector<1x256xi1> to vector<8x256xi1>
    %61 = arith.select %60, %57, %58 : vector<8x256xi1>, vector<8x256xbf16>
    %62 = tpu.concatenate %55, %56, %61 in 0 : vector<8x256xbf16>, vector<8x256xbf16>, vector<8x256xbf16> -> vector<24x256xbf16>
    %c0_42 = arith.constant 0 : index
    %c0_43 = arith.constant 0 : index
    %c0_44 = arith.constant 0 : index
    %63 = vector.load %arg7[%c0_42, %c0_43, %c0_44] : memref<3x4x24xbf16, #tpu.memory_space<vmem>>, vector<1x4x24xbf16>
    %64 = vector.shape_cast %63 : vector<1x4x24xbf16> to vector<4x24xbf16>
    %cst_45 = arith.constant dense<0.000000e+00> : vector<4x256xf32>
    %65 = tpu.matmul %64, %62, %cst_45 {dimension_numbers = #tpu.dot_dimension_numbers<[1], [0], [0], [1], [0, 0, 1, 1], [], []>} : vector<4x24xbf16>, vector<24x256xbf16>, vector<4x256xf32> -> vector<4x256xf32>
    %66 = vector.extract_strided_slice %50 {offsets = [0, 16], sizes = [8, 256], strides = [1, 1]} : vector<8x290xbf16> to vector<8x256xbf16>
    %cst_46 = arith.constant 0.000000e+00 : bf16
    %67 = vector.broadcast %cst_46 : bf16 to vector<8x256xbf16>
    %68 = vector.shape_cast %3 : vector<1x256xi1> to vector<1x256xi1>
    %69 = vector.broadcast %68 : vector<1x256xi1> to vector<8x256xi1>
    %70 = arith.select %69, %66, %67 : vector<8x256xi1>, vector<8x256xbf16>
    %71 = vector.extract_strided_slice %50 {offsets = [0, 17], sizes = [8, 256], strides = [1, 1]} : vector<8x290xbf16> to vector<8x256xbf16>
    %72 = vector.extract_strided_slice %50 {offsets = [0, 18], sizes = [8, 256], strides = [1, 1]} : vector<8x290xbf16> to vector<8x256xbf16>
    %cst_47 = arith.constant 0.000000e+00 : bf16
    %73 = vector.broadcast %cst_47 : bf16 to vector<8x256xbf16>
    %74 = vector.shape_cast %6 : vector<1x256xi1> to vector<1x256xi1>
    %75 = vector.broadcast %74 : vector<1x256xi1> to vector<8x256xi1>
    %76 = arith.select %75, %72, %73 : vector<8x256xi1>, vector<8x256xbf16>
    %77 = tpu.concatenate %70, %71, %76 in 0 : vector<8x256xbf16>, vector<8x256xbf16>, vector<8x256xbf16> -> vector<24x256xbf16>
    %c1_48 = arith.constant 1 : index
    %c0_49 = arith.constant 0 : index
    %c0_50 = arith.constant 0 : index
    %78 = vector.load %arg7[%c1_48, %c0_49, %c0_50] : memref<3x4x24xbf16, #tpu.memory_space<vmem>>, vector<1x4x24xbf16>
    %79 = vector.shape_cast %78 : vector<1x4x24xbf16> to vector<4x24xbf16>
    %cst_51 = arith.constant dense<0.000000e+00> : vector<4x256xf32>
    %80 = tpu.matmul %79, %77, %cst_51 {dimension_numbers = #tpu.dot_dimension_numbers<[1], [0], [0], [1], [0, 0, 1, 1], [], []>} : vector<4x24xbf16>, vector<24x256xbf16>, vector<4x256xf32> -> vector<4x256xf32>
    %81 = arith.addf %65, %80 : vector<4x256xf32>
    %82 = vector.extract_strided_slice %50 {offsets = [0, 32], sizes = [8, 256], strides = [1, 1]} : vector<8x290xbf16> to vector<8x256xbf16>
    %cst_52 = arith.constant 0.000000e+00 : bf16
    %83 = vector.broadcast %cst_52 : bf16 to vector<8x256xbf16>
    %84 = vector.shape_cast %3 : vector<1x256xi1> to vector<1x256xi1>
    %85 = vector.broadcast %84 : vector<1x256xi1> to vector<8x256xi1>
    %86 = arith.select %85, %82, %83 : vector<8x256xi1>, vector<8x256xbf16>
    %87 = vector.extract_strided_slice %50 {offsets = [0, 33], sizes = [8, 256], strides = [1, 1]} : vector<8x290xbf16> to vector<8x256xbf16>
    %88 = vector.extract_strided_slice %50 {offsets = [0, 34], sizes = [8, 256], strides = [1, 1]} : vector<8x290xbf16> to vector<8x256xbf16>
    %cst_53 = arith.constant 0.000000e+00 : bf16
    %89 = vector.broadcast %cst_53 : bf16 to vector<8x256xbf16>
    %90 = vector.shape_cast %6 : vector<1x256xi1> to vector<1x256xi1>
    %91 = vector.broadcast %90 : vector<1x256xi1> to vector<8x256xi1>
    %92 = arith.select %91, %88, %89 : vector<8x256xi1>, vector<8x256xbf16>
    %93 = tpu.concatenate %86, %87, %92 in 0 : vector<8x256xbf16>, vector<8x256xbf16>, vector<8x256xbf16> -> vector<24x256xbf16>
    %c2_54 = arith.constant 2 : index
    %c0_55 = arith.constant 0 : index
    %c0_56 = arith.constant 0 : index
    %94 = vector.load %arg7[%c2_54, %c0_55, %c0_56] : memref<3x4x24xbf16, #tpu.memory_space<vmem>>, vector<1x4x24xbf16>
    %95 = vector.shape_cast %94 : vector<1x4x24xbf16> to vector<4x24xbf16>
    %cst_57 = arith.constant dense<0.000000e+00> : vector<4x256xf32>
    %96 = tpu.matmul %95, %93, %cst_57 {dimension_numbers = #tpu.dot_dimension_numbers<[1], [0], [0], [1], [0, 0, 1, 1], [], []>} : vector<4x24xbf16>, vector<24x256xbf16>, vector<4x256xf32> -> vector<4x256xf32>
    %97 = arith.addf %81, %96 : vector<4x256xf32>
    %98 = arith.truncf %97 : vector<4x256xf32> to vector<4x256xbf16>
    %c0_58 = arith.constant 0 : index
    %c0_59 = arith.constant 0 : index
    %c0_60 = arith.constant 0 : index
    %99 = vector.load %arg8[%c0_58, %c0_59, %c0_60] : memref<1x4x256xbf16, #tpu.memory_space<vmem>>, vector<1x4x256xbf16>
    %100 = vector.shape_cast %99 : vector<1x4x256xbf16> to vector<4x256xbf16>
    %101 = vector.shape_cast %98 : vector<4x256xbf16> to vector<1x4x256xbf16>
    tpu.vector_store %arg8[%c0_58, %c0_59, %c0_60], %101 {strides = array<i32>} : memref<1x4x256xbf16, #tpu.memory_space<vmem>>, vector<1x4x256xbf16>,
    %cst_61 = arith.constant dense<0.000000e+00> : vector<4xf32>
    %102 = vector.multi_reduction <add>, %97, %cst_61 [1] : vector<4x256xf32> to vector<4xf32>
    %103 = vector.shape_cast %102 : vector<4xf32> to vector<4x1xf32>
    %104 = arith.mulf %97, %97 : vector<4x256xf32>
    %cst_62 = arith.constant dense<0.000000e+00> : vector<4xf32>
    %105 = vector.multi_reduction <add>, %104, %cst_62 [1] : vector<4x256xf32> to vector<4xf32>
    %106 = vector.shape_cast %105 : vector<4xf32> to vector<4x1xf32>
    %107 = tpu.concatenate %103, %106 in 1 : vector<4x1xf32>, vector<4x1xf32> -> vector<4x2xf32>
    %c0_63 = arith.constant 0 : index
    %c0_64 = arith.constant 0 : index
    %c0_65 = arith.constant 0 : index
    %108 = vector.load %arg9[%c0_63, %c0_64, %c0_65] : memref<1x4x2xf32, #tpu.memory_space<vmem>>, vector<1x4x2xf32>
    %109 = vector.shape_cast %108 : vector<1x4x2xf32> to vector<4x2xf32>
    %110 = vector.shape_cast %107 : vector<4x2xf32> to vector<1x4x2xf32>
    tpu.vector_store %arg9[%c0_63, %c0_64, %c0_65], %110 {strides = array<i32>} : memref<1x4x2xf32, #tpu.memory_space<vmem>>, vector<1x4x2xf32>,
    return
  }
  func.func @transform_0(%arg0: i32) -> (i32, i32, i32) {
    %c0_i32 = arith.constant 0 : i32
    %c0_i32_0 = arith.constant 0 : i32
    %c0_i32_1 = arith.constant 0 : i32
    return %arg0, %c0_i32, %c0_i32_0 : i32, i32, i32
  }
  func.func @transform_1(%arg0: i32) -> (i32, i32, i32) {
    %c0_i32 = arith.constant 0 : i32
    %c0_i32_0 = arith.constant 0 : i32
    %c0_i32_1 = arith.constant 0 : i32
    return %arg0, %c0_i32, %c0_i32_0 : i32, i32, i32
  }
  func.func @transform_2(%arg0: i32) -> (i32, i32, i32) {
    %c0_i32 = arith.constant 0 : i32
    %c0_i32_0 = arith.constant 0 : i32
    %c0_i32_1 = arith.constant 0 : i32
    %c0_i32_2 = arith.constant 0 : i32
    return %c0_i32, %c0_i32_0, %c0_i32_1 : i32, i32, i32
  }
  func.func @transform_3(%arg0: i32) -> (i32, i32) {
    %c0_i32 = arith.constant 0 : i32
    %c0_i32_0 = arith.constant 0 : i32
    %c0_i32_1 = arith.constant 0 : i32
    return %c0_i32, %c0_i32_0 : i32, i32
  }
  func.func @transform_4(%arg0: i32) -> (i32, i32, i32) {
    %c0_i32 = arith.constant 0 : i32
    %c0_i32_0 = arith.constant 0 : i32
    %c0_i32_1 = arith.constant 0 : i32
    %c0_i32_2 = arith.constant 0 : i32
    return %c0_i32, %c0_i32_0, %c0_i32_1 : i32, i32, i32
  }
  func.func @transform_5(%arg0: i32) -> (i32, i32) {
    %c0_i32 = arith.constant 0 : i32
    %c0_i32_0 = arith.constant 0 : i32
    %c0_i32_1 = arith.constant 0 : i32
    return %c0_i32, %c0_i32_0 : i32, i32
  }
  func.func @transform_6(%arg0: i32) -> (i32, i32, i32) {
    %c0_i32 = arith.constant 0 : i32
    %c0_i32_0 = arith.constant 0 : i32
    %c0_i32_1 = arith.constant 0 : i32
    %c0_i32_2 = arith.constant 0 : i32
    return %c0_i32, %c0_i32_0, %c0_i32_1 : i32, i32, i32
  }
  func.func @transform_7(%arg0: i32) -> (i32, i32, i32) {
    %c0_i32 = arith.constant 0 : i32
    %c0_i32_0 = arith.constant 0 : i32
    %c0_i32_1 = arith.constant 0 : i32
    return %arg0, %c0_i32, %c0_i32_0 : i32, i32, i32
  }
  func.func @transform_8(%arg0: i32) -> (i32, i32, i32) {
    %c0_i32 = arith.constant 0 : i32
    %c0_i32_0 = arith.constant 0 : i32
    %c0_i32_1 = arith.constant 0 : i32
    return %arg0, %c0_i32, %c0_i32_0 : i32, i32, i32
  }
}

module attributes {stable_mosaic.version = 11 : i64} {
  func.func @bn_relu_kernel(%arg0: i32, %arg1: memref<1x4x256xbf16, #tpu.memory_space<vmem>>, %arg2: memref<4x1xf32, #tpu.memory_space<vmem>>, %arg3: memref<4x1xf32, #tpu.memory_space<vmem>>, %arg4: memref<1x4x256xf32, #tpu.memory_space<vmem>>) attributes {dimension_semantics = [#tpu.dimension_semantics<parallel>], iteration_bounds = array<i64: 2>, scalar_prefetch = 0 : i64, scratch_operands = 0 : i64, tpu.core_type = #tpu.core_type<tc>, window_params = [{transform_indices = @transform_0, window_bounds = array<i64: 1, 4, 256>}, {pipeline_mode = #tpu.pipeline_mode<synchronous>, transform_indices = @transform_1, window_bounds = array<i64: 4, 1>}, {pipeline_mode = #tpu.pipeline_mode<synchronous>, transform_indices = @transform_2, window_bounds = array<i64: 4, 1>}, {transform_indices = @transform_3, window_bounds = array<i64: 1, 4, 256>}]} {
    %c0 = arith.constant 0 : index
    %c0_0 = arith.constant 0 : index
    %c0_1 = arith.constant 0 : index
    %0 = vector.load %arg1[%c0, %c0_0, %c0_1] : memref<1x4x256xbf16, #tpu.memory_space<vmem>>, vector<1x4x256xbf16>
    %1 = vector.shape_cast %0 : vector<1x4x256xbf16> to vector<4x256xbf16>
    %2 = arith.extf %1 : vector<4x256xbf16> to vector<4x256xf32>
    %c0_2 = arith.constant 0 : index
    %c0_3 = arith.constant 0 : index
    %3 = vector.load %arg2[%c0_2, %c0_3] : memref<4x1xf32, #tpu.memory_space<vmem>>, vector<4x1xf32>
    %4 = vector.broadcast %3 : vector<4x1xf32> to vector<4x256xf32>
    %5 = arith.mulf %2, %4 : vector<4x256xf32>
    %c0_4 = arith.constant 0 : index
    %c0_5 = arith.constant 0 : index
    %6 = vector.load %arg3[%c0_4, %c0_5] : memref<4x1xf32, #tpu.memory_space<vmem>>, vector<4x1xf32>
    %7 = vector.broadcast %6 : vector<4x1xf32> to vector<4x256xf32>
    %8 = arith.addf %5, %7 : vector<4x256xf32>
    %cst = arith.constant 0.000000e+00 : f32
    %9 = vector.broadcast %cst : f32 to vector<4x256xf32>
    %10 = arith.maximumf %8, %9 : vector<4x256xf32>
    %c0_6 = arith.constant 0 : index
    %c0_7 = arith.constant 0 : index
    %c0_8 = arith.constant 0 : index
    %11 = vector.load %arg4[%c0_6, %c0_7, %c0_8] : memref<1x4x256xf32, #tpu.memory_space<vmem>>, vector<1x4x256xf32>
    %12 = vector.shape_cast %11 : vector<1x4x256xf32> to vector<4x256xf32>
    %13 = vector.shape_cast %10 : vector<4x256xf32> to vector<1x4x256xf32>
    tpu.vector_store %arg4[%c0_6, %c0_7, %c0_8], %13 {strides = array<i32>} : memref<1x4x256xf32, #tpu.memory_space<vmem>>, vector<1x4x256xf32>,
    return
  }
  func.func @transform_0(%arg0: i32) -> (i32, i32, i32) {
    %c0_i32 = arith.constant 0 : i32
    %c0_i32_0 = arith.constant 0 : i32
    %c0_i32_1 = arith.constant 0 : i32
    return %arg0, %c0_i32, %c0_i32_0 : i32, i32, i32
  }
  func.func @transform_1(%arg0: i32) -> (i32, i32) {
    %c0_i32 = arith.constant 0 : i32
    %c0_i32_0 = arith.constant 0 : i32
    %c0_i32_1 = arith.constant 0 : i32
    return %c0_i32, %c0_i32_0 : i32, i32
  }
  func.func @transform_2(%arg0: i32) -> (i32, i32) {
    %c0_i32 = arith.constant 0 : i32
    %c0_i32_0 = arith.constant 0 : i32
    %c0_i32_1 = arith.constant 0 : i32
    return %c0_i32, %c0_i32_0 : i32, i32
  }
  func.func @transform_3(%arg0: i32) -> (i32, i32, i32) {
    %c0_i32 = arith.constant 0 : i32
    %c0_i32_0 = arith.constant 0 : i32
    %c0_i32_1 = arith.constant 0 : i32
    return %arg0, %c0_i32, %c0_i32_0 : i32, i32, i32
  }
}

module attributes {stable_mosaic.version = 11 : i64} {
  func.func @conv2_kernel(%arg0: i32, %arg1: memref<1x4x256xbf16, #tpu.memory_space<vmem>>, %arg2: memref<4x1xf32, #tpu.memory_space<vmem>>, %arg3: memref<4x1xf32, #tpu.memory_space<vmem>>, %arg4: memref<2x256xf32, #tpu.memory_space<vmem>>, %arg5: memref<3x4x12xbf16, #tpu.memory_space<vmem>>, %arg6: memref<1x4x256xbf16, #tpu.memory_space<vmem>>, %arg7: memref<1x4x2xf32, #tpu.memory_space<vmem>>) attributes {dimension_semantics = [#tpu.dimension_semantics<parallel>], iteration_bounds = array<i64: 2>, scalar_prefetch = 0 : i64, scratch_operands = 0 : i64, tpu.core_type = #tpu.core_type<tc>, window_params = [{transform_indices = @transform_0, window_bounds = array<i64: 1, 4, 256>}, {pipeline_mode = #tpu.pipeline_mode<synchronous>, transform_indices = @transform_1, window_bounds = array<i64: 4, 1>}, {pipeline_mode = #tpu.pipeline_mode<synchronous>, transform_indices = @transform_2, window_bounds = array<i64: 4, 1>}, {pipeline_mode = #tpu.pipeline_mode<synchronous>, transform_indices = @transform_3, window_bounds = array<i64: 2, 256>}, {pipeline_mode = #tpu.pipeline_mode<synchronous>, transform_indices = @transform_4, window_bounds = array<i64: 3, 4, 12>}, {transform_indices = @transform_5, window_bounds = array<i64: 1, 4, 256>}, {transform_indices = @transform_6, window_bounds = array<i64: 1, 4, 2>}]} {
    %c0 = arith.constant 0 : index
    %c0_0 = arith.constant 0 : index
    %0 = vector.load %arg4[%c0, %c0_0] : memref<2x256xf32, #tpu.memory_space<vmem>>, vector<2x256xf32>
    %1 = vector.extract_strided_slice %0 {offsets = [0, 0], sizes = [1, 256], strides = [1, 1]} : vector<2x256xf32> to vector<1x256xf32>
    %cst = arith.constant 5.000000e-01 : f32
    %2 = vector.broadcast %cst : f32 to vector<1x256xf32>
    %3 = arith.cmpf ogt, %1, %2 : vector<1x256xf32>
    %4 = vector.extract_strided_slice %0 {offsets = [1, 0], sizes = [1, 256], strides = [1, 1]} : vector<2x256xf32> to vector<1x256xf32>
    %cst_1 = arith.constant 5.000000e-01 : f32
    %5 = vector.broadcast %cst_1 : f32 to vector<1x256xf32>
    %6 = arith.cmpf ogt, %4, %5 : vector<1x256xf32>
    %c0_2 = arith.constant 0 : index
    %c0_3 = arith.constant 0 : index
    %c0_4 = arith.constant 0 : index
    %7 = vector.load %arg1[%c0_2, %c0_3, %c0_4] : memref<1x4x256xbf16, #tpu.memory_space<vmem>>, vector<1x4x256xbf16>
    %8 = vector.shape_cast %7 : vector<1x4x256xbf16> to vector<4x256xbf16>
    %9 = arith.extf %8 : vector<4x256xbf16> to vector<4x256xf32>
    %c0_5 = arith.constant 0 : index
    %c0_6 = arith.constant 0 : index
    %10 = vector.load %arg2[%c0_5, %c0_6] : memref<4x1xf32, #tpu.memory_space<vmem>>, vector<4x1xf32>
    %11 = vector.broadcast %10 : vector<4x1xf32> to vector<4x256xf32>
    %12 = arith.mulf %9, %11 : vector<4x256xf32>
    %c0_7 = arith.constant 0 : index
    %c0_8 = arith.constant 0 : index
    %13 = vector.load %arg3[%c0_7, %c0_8] : memref<4x1xf32, #tpu.memory_space<vmem>>, vector<4x1xf32>
    %14 = vector.broadcast %13 : vector<4x1xf32> to vector<4x256xf32>
    %15 = arith.addf %12, %14 : vector<4x256xf32>
    %cst_9 = arith.constant 0.000000e+00 : f32
    %16 = vector.broadcast %cst_9 : f32 to vector<4x256xf32>
    %17 = arith.maximumf %15, %16 : vector<4x256xf32>
    %18 = arith.truncf %17 : vector<4x256xf32> to vector<4x256xbf16>
    %cst_10 = arith.constant 0.000000e+00 : bf16
    %19 = vector.broadcast %cst_10 : bf16 to vector<4x17xbf16>
    %20 = tpu.concatenate %19, %18, %19 in 1 : vector<4x17xbf16>, vector<4x256xbf16>, vector<4x17xbf16> -> vector<4x290xbf16>
    %21 = vector.extract_strided_slice %20 {offsets = [0, 0], sizes = [4, 256], strides = [1, 1]} : vector<4x290xbf16> to vector<4x256xbf16>
    %cst_11 = arith.constant 0.000000e+00 : bf16
    %22 = vector.broadcast %cst_11 : bf16 to vector<4x256xbf16>
    %23 = vector.shape_cast %3 : vector<1x256xi1> to vector<1x256xi1>
    %24 = vector.broadcast %23 : vector<1x256xi1> to vector<4x256xi1>
    %25 = arith.select %24, %21, %22 : vector<4x256xi1>, vector<4x256xbf16>
    %26 = vector.extract_strided_slice %20 {offsets = [0, 1], sizes = [4, 256], strides = [1, 1]} : vector<4x290xbf16> to vector<4x256xbf16>
    %27 = vector.extract_strided_slice %20 {offsets = [0, 2], sizes = [4, 256], strides = [1, 1]} : vector<4x290xbf16> to vector<4x256xbf16>
    %cst_12 = arith.constant 0.000000e+00 : bf16
    %28 = vector.broadcast %cst_12 : bf16 to vector<4x256xbf16>
    %29 = vector.shape_cast %6 : vector<1x256xi1> to vector<1x256xi1>
    %30 = vector.broadcast %29 : vector<1x256xi1> to vector<4x256xi1>
    %31 = arith.select %30, %27, %28 : vector<4x256xi1>, vector<4x256xbf16>
    %32 = tpu.concatenate %25, %26, %31 in 0 : vector<4x256xbf16>, vector<4x256xbf16>, vector<4x256xbf16> -> vector<12x256xbf16>
    %c0_13 = arith.constant 0 : index
    %c0_14 = arith.constant 0 : index
    %c0_15 = arith.constant 0 : index
    %33 = vector.load %arg5[%c0_13, %c0_14, %c0_15] : memref<3x4x12xbf16, #tpu.memory_space<vmem>>, vector<1x4x12xbf16>
    %34 = vector.shape_cast %33 : vector<1x4x12xbf16> to vector<4x12xbf16>
    %cst_16 = arith.constant dense<0.000000e+00> : vector<4x256xf32>
    %35 = tpu.matmul %34, %32, %cst_16 {dimension_numbers = #tpu.dot_dimension_numbers<[1], [0], [0], [1], [0, 0, 1, 1], [], []>} : vector<4x12xbf16>, vector<12x256xbf16>, vector<4x256xf32> -> vector<4x256xf32>
    %36 = vector.extract_strided_slice %20 {offsets = [0, 16], sizes = [4, 256], strides = [1, 1]} : vector<4x290xbf16> to vector<4x256xbf16>
    %cst_17 = arith.constant 0.000000e+00 : bf16
    %37 = vector.broadcast %cst_17 : bf16 to vector<4x256xbf16>
    %38 = vector.shape_cast %3 : vector<1x256xi1> to vector<1x256xi1>
    %39 = vector.broadcast %38 : vector<1x256xi1> to vector<4x256xi1>
    %40 = arith.select %39, %36, %37 : vector<4x256xi1>, vector<4x256xbf16>
    %41 = vector.extract_strided_slice %20 {offsets = [0, 17], sizes = [4, 256], strides = [1, 1]} : vector<4x290xbf16> to vector<4x256xbf16>
    %42 = vector.extract_strided_slice %20 {offsets = [0, 18], sizes = [4, 256], strides = [1, 1]} : vector<4x290xbf16> to vector<4x256xbf16>
    %cst_18 = arith.constant 0.000000e+00 : bf16
    %43 = vector.broadcast %cst_18 : bf16 to vector<4x256xbf16>
    %44 = vector.shape_cast %6 : vector<1x256xi1> to vector<1x256xi1>
    %45 = vector.broadcast %44 : vector<1x256xi1> to vector<4x256xi1>
    %46 = arith.select %45, %42, %43 : vector<4x256xi1>, vector<4x256xbf16>
    %47 = tpu.concatenate %40, %41, %46 in 0 : vector<4x256xbf16>, vector<4x256xbf16>, vector<4x256xbf16> -> vector<12x256xbf16>
    %c1 = arith.constant 1 : index
    %c0_19 = arith.constant 0 : index
    %c0_20 = arith.constant 0 : index
    %48 = vector.load %arg5[%c1, %c0_19, %c0_20] : memref<3x4x12xbf16, #tpu.memory_space<vmem>>, vector<1x4x12xbf16>
    %49 = vector.shape_cast %48 : vector<1x4x12xbf16> to vector<4x12xbf16>
    %cst_21 = arith.constant dense<0.000000e+00> : vector<4x256xf32>
    %50 = tpu.matmul %49, %47, %cst_21 {dimension_numbers = #tpu.dot_dimension_numbers<[1], [0], [0], [1], [0, 0, 1, 1], [], []>} : vector<4x12xbf16>, vector<12x256xbf16>, vector<4x256xf32> -> vector<4x256xf32>
    %51 = arith.addf %35, %50 : vector<4x256xf32>
    %52 = vector.extract_strided_slice %20 {offsets = [0, 32], sizes = [4, 256], strides = [1, 1]} : vector<4x290xbf16> to vector<4x256xbf16>
    %cst_22 = arith.constant 0.000000e+00 : bf16
    %53 = vector.broadcast %cst_22 : bf16 to vector<4x256xbf16>
    %54 = vector.shape_cast %3 : vector<1x256xi1> to vector<1x256xi1>
    %55 = vector.broadcast %54 : vector<1x256xi1> to vector<4x256xi1>
    %56 = arith.select %55, %52, %53 : vector<4x256xi1>, vector<4x256xbf16>
    %57 = vector.extract_strided_slice %20 {offsets = [0, 33], sizes = [4, 256], strides = [1, 1]} : vector<4x290xbf16> to vector<4x256xbf16>
    %58 = vector.extract_strided_slice %20 {offsets = [0, 34], sizes = [4, 256], strides = [1, 1]} : vector<4x290xbf16> to vector<4x256xbf16>
    %cst_23 = arith.constant 0.000000e+00 : bf16
    %59 = vector.broadcast %cst_23 : bf16 to vector<4x256xbf16>
    %60 = vector.shape_cast %6 : vector<1x256xi1> to vector<1x256xi1>
    %61 = vector.broadcast %60 : vector<1x256xi1> to vector<4x256xi1>
    %62 = arith.select %61, %58, %59 : vector<4x256xi1>, vector<4x256xbf16>
    %63 = tpu.concatenate %56, %57, %62 in 0 : vector<4x256xbf16>, vector<4x256xbf16>, vector<4x256xbf16> -> vector<12x256xbf16>
    %c2 = arith.constant 2 : index
    %c0_24 = arith.constant 0 : index
    %c0_25 = arith.constant 0 : index
    %64 = vector.load %arg5[%c2, %c0_24, %c0_25] : memref<3x4x12xbf16, #tpu.memory_space<vmem>>, vector<1x4x12xbf16>
    %65 = vector.shape_cast %64 : vector<1x4x12xbf16> to vector<4x12xbf16>
    %cst_26 = arith.constant dense<0.000000e+00> : vector<4x256xf32>
    %66 = tpu.matmul %65, %63, %cst_26 {dimension_numbers = #tpu.dot_dimension_numbers<[1], [0], [0], [1], [0, 0, 1, 1], [], []>} : vector<4x12xbf16>, vector<12x256xbf16>, vector<4x256xf32> -> vector<4x256xf32>
    %67 = arith.addf %51, %66 : vector<4x256xf32>
    %68 = arith.truncf %67 : vector<4x256xf32> to vector<4x256xbf16>
    %c0_27 = arith.constant 0 : index
    %c0_28 = arith.constant 0 : index
    %c0_29 = arith.constant 0 : index
    %69 = vector.load %arg6[%c0_27, %c0_28, %c0_29] : memref<1x4x256xbf16, #tpu.memory_space<vmem>>, vector<1x4x256xbf16>
    %70 = vector.shape_cast %69 : vector<1x4x256xbf16> to vector<4x256xbf16>
    %71 = vector.shape_cast %68 : vector<4x256xbf16> to vector<1x4x256xbf16>
    tpu.vector_store %arg6[%c0_27, %c0_28, %c0_29], %71 {strides = array<i32>} : memref<1x4x256xbf16, #tpu.memory_space<vmem>>, vector<1x4x256xbf16>,
    %cst_30 = arith.constant dense<0.000000e+00> : vector<4xf32>
    %72 = vector.multi_reduction <add>, %67, %cst_30 [1] : vector<4x256xf32> to vector<4xf32>
    %73 = vector.shape_cast %72 : vector<4xf32> to vector<4x1xf32>
    %74 = arith.mulf %67, %67 : vector<4x256xf32>
    %cst_31 = arith.constant dense<0.000000e+00> : vector<4xf32>
    %75 = vector.multi_reduction <add>, %74, %cst_31 [1] : vector<4x256xf32> to vector<4xf32>
    %76 = vector.shape_cast %75 : vector<4xf32> to vector<4x1xf32>
    %77 = tpu.concatenate %73, %76 in 1 : vector<4x1xf32>, vector<4x1xf32> -> vector<4x2xf32>
    %c0_32 = arith.constant 0 : index
    %c0_33 = arith.constant 0 : index
    %c0_34 = arith.constant 0 : index
    %78 = vector.load %arg7[%c0_32, %c0_33, %c0_34] : memref<1x4x2xf32, #tpu.memory_space<vmem>>, vector<1x4x2xf32>
    %79 = vector.shape_cast %78 : vector<1x4x2xf32> to vector<4x2xf32>
    %80 = vector.shape_cast %77 : vector<4x2xf32> to vector<1x4x2xf32>
    tpu.vector_store %arg7[%c0_32, %c0_33, %c0_34], %80 {strides = array<i32>} : memref<1x4x2xf32, #tpu.memory_space<vmem>>, vector<1x4x2xf32>,
    return
  }
  func.func @transform_0(%arg0: i32) -> (i32, i32, i32) {
    %c0_i32 = arith.constant 0 : i32
    %c0_i32_0 = arith.constant 0 : i32
    %c0_i32_1 = arith.constant 0 : i32
    return %arg0, %c0_i32, %c0_i32_0 : i32, i32, i32
  }
  func.func @transform_1(%arg0: i32) -> (i32, i32) {
    %c0_i32 = arith.constant 0 : i32
    %c0_i32_0 = arith.constant 0 : i32
    %c0_i32_1 = arith.constant 0 : i32
    return %c0_i32, %c0_i32_0 : i32, i32
  }
  func.func @transform_2(%arg0: i32) -> (i32, i32) {
    %c0_i32 = arith.constant 0 : i32
    %c0_i32_0 = arith.constant 0 : i32
    %c0_i32_1 = arith.constant 0 : i32
    return %c0_i32, %c0_i32_0 : i32, i32
  }
  func.func @transform_3(%arg0: i32) -> (i32, i32) {
    %c0_i32 = arith.constant 0 : i32
    %c0_i32_0 = arith.constant 0 : i32
    %c0_i32_1 = arith.constant 0 : i32
    return %c0_i32, %c0_i32_0 : i32, i32
  }
  func.func @transform_4(%arg0: i32) -> (i32, i32, i32) {
    %c0_i32 = arith.constant 0 : i32
    %c0_i32_0 = arith.constant 0 : i32
    %c0_i32_1 = arith.constant 0 : i32
    %c0_i32_2 = arith.constant 0 : i32
    return %c0_i32, %c0_i32_0, %c0_i32_1 : i32, i32, i32
  }
  func.func @transform_5(%arg0: i32) -> (i32, i32, i32) {
    %c0_i32 = arith.constant 0 : i32
    %c0_i32_0 = arith.constant 0 : i32
    %c0_i32_1 = arith.constant 0 : i32
    return %arg0, %c0_i32, %c0_i32_0 : i32, i32, i32
  }
  func.func @transform_6(%arg0: i32) -> (i32, i32, i32) {
    %c0_i32 = arith.constant 0 : i32
    %c0_i32_0 = arith.constant 0 : i32
    %c0_i32_1 = arith.constant 0 : i32
    return %arg0, %c0_i32, %c0_i32_0 : i32, i32, i32
  }
}

</mosaic_0001>

<bundles_post_ra>
// kernel: decoder_block.5
= control target key start
LH: loop header
LB: loop body
LE: loop exit
PB: predicated region body
PF: predicated region fallthrough
CT: control target
= control target key end

     0   :  { %s312_s12 = smov 0   ;;  %s335_s0 = inlined_call_operand.vmem [shape: bf16[2,4,256], index: 0, kind: input, shape index: {}]   ;;  %s336_s1 = inlined_call_operand.vmem [shape: f32[4,1], index: 1, kind: input, shape index: {}]   ;;  %s337_s2 = inlined_call_operand.vmem [shape: f32[4,1], index: 2, kind: input, shape index: {}]   ;;  %s338_s3 = inlined_call_operand.vmem [shape: f32[2,4,256], index: 3, kind: output, shape index: {}]  }
   0x1 LB: > { %s258_s13 = sadd.s32 4294967295, %s288_s12   ;;  %p262_p0 = scmp.ge.s32.totalorder %s288_s12, 1  ;;  %s288_s12 = sphi %s312_s12, %s13_s12  }
   0x2   : > { %p137_p1 = scmp.lt.s32.totalorder %s288_s12, 3 }
   0x4   : > { %p138_p2 = pnand %p262_p0, %p137_p1 }
   0x5   : > { %p161_p3 = scmp.lt.s32.totalorder (!%p138_p2), %s258_s13, 1 }
   0x6   : > { %141 = sbr.rel (%p138_p2) target bundleno = 148 (0x94), region = 32 }
   0xb   : > { %v173_v0 = vld [vmem:[%s336_s1] sm:$0xf]  ;;  %v290_v1 = vmov 0   ;;  %s340_s13 = smov (!%p161_p3, %s258_s13), 1  ;;  %v291_v3 = vmov 839922192   ;;  %v181_v5 = vlaneseq }
   0xc   : > { %281 = vset.pattern.permute.xlu0 %v290_v1  ;;  %v187_v2 = vld [vmem:[%s337_s2] sm:$0xf]  ;;  %v179_v4 = vunpack.c.l.s4 %v291_v3  ;;  %s269_s18 = sshll.u32 %s340_s13, 2  ;;  %s270_s22 = sshll.u32 %s340_s13, 3 }
   0xd   : > { %176 = vperm.xlu0 %281, %v173_v0   ;;  %v182_v7 = vshrl.u32 %v181_v5, 7  ;;  %s165_s21 = scalar_lea.vmem %s335_s0, %s269_s18  ;;  %s170_s25 = scalar_lea.vmem %s338_s3, %s270_s22 }
   0xe   : > { %v180_v6 = vunpack.c.0.s8 %v179_v4  ;;  %v171_v9 = vld [vmem:[%s165_s21] sm:$0xf] }
   0xf   : > { %v172_v11 = vunpack.c.l.bf16 %v171_v9 }
  0x10   : > { %v183_v8 = vsub.s32 %v180_v6, %v182_v7 }
  0x11   : > { %190 = vperm.xlu0 %281, %v187_v2  }
  0x88   : > { %v177_v10 = vpop.permute.xlu0 %176 }
  0x89   : > { %v184_v12 = vrot.slane %v177_v10, %v183_v8 }
  0x8b   : > { %v186_v14 = vmul.f32 %v184_v12, %v172_v11 }
  0x8c   : > { %v191_v13 = vpop.permute.xlu0 %190 }
  0x8d   : > { %v198_v15 = vrot.slane %v191_v13, %v183_v8 }
  0x8f   : > { %v200_v16 = vadd.f32 %v198_v15, %v186_v14 }
  0x91   : > { %v201_v17 = vmax.f32 %v200_v16, 0.0 }
  0x93   : > { %202 = vst [vmem:[%s170_s25] sm:$0xff] %v201_v17 }
  0x94 PF: > { %s13_s12 = sadd.s32 1, %s288_s12  }
  0x95   : > { %p10_p4 = scmp.ge.s32.totalorder %s13_s12, 4  }
  0x97   :  { %12 = sbr.rel (!%p10_p4) target bundleno = 1 (0x1), region = 62 }

// kernel: decoder_block.4
= control target key start
LH: loop header
LB: loop body
LE: loop exit
PB: predicated region body
PF: predicated region fallthrough
CT: control target
= control target key end

     0   :  { %s933_s21 = smov 0   ;;  %s1070_s0 = inlined_call_operand.vmem [shape: bf16[2,4,256], index: 0, kind: input, shape index: {}]   ;;  %s1071_s1 = inlined_call_operand.vmem [shape: f32[4,1], index: 1, kind: input, shape index: {}]   ;;  %s1072_s2 = inlined_call_operand.vmem [shape: f32[4,1], index: 2, kind: input, shape index: {}]   ;;  %s1073_s3 = inlined_call_operand.vmem [shape: f32[2,256], index: 3, kind: input, shape index: {}]   ;;  %s1074_s4 = inlined_call_operand.vmem [shape: bf16[3,4,12], index: 4, kind: input, shape index: {}]   ;;  %s1075_s5 = inlined_call_operand.vmem [shape: bf16[2,4,256], index: 5, kind: output, shape index: {0}]   ;;  %s1076_s6 = inlined_call_operand.vmem [shape: f32[2,4,2], index: 6, kind: output, shape index: {1}]  }
   0x1 LB: > { %s833_s22 = sadd.s32 4294967295, %s884_s21   ;;  %p837_p0 = scmp.ge.s32.totalorder %s884_s21, 1  ;;  %s884_s21 = sphi %s933_s21, %s17_s21  }
   0x2   : > { %p215_p1 = scmp.lt.s32.totalorder %s884_s21, 3 }
   0x4   : > { %p216_p2 = pnand %p837_p0, %p215_p1 }
   0x5   : > { %s887_s29 = smov (!%p216_p2), 18   ;;  %p249_p3 = scmp.lt.s32.totalorder (!%p216_p2), %s833_s22, 1 }
   0x6   : > { %219 = sbr.rel (%p216_p2) target bundleno = 867 (0x363), region = 40  ;;  %s889_s10 = smov (!%p216_p2), 17  }
   0x7   : > { %s890_s11 = smov (!%p216_p2), 34   ;;  %s891_s12 = smov (!%p216_p2), 16  }
   0x8   : > { %s892_s13 = smov (!%p216_p2), 2   ;;  %s893_s14 = smov (!%p216_p2), 32  }
   0x9   : > { %s894_s15 = smov (!%p216_p2), 127   ;;  %s895_s16 = smov (!%p216_p2), 126  }
   0xa   : > { %s896_s17 = smov (!%p216_p2), 112   ;;  %s897_s18 = smov (!%p216_p2), 96  }
   0xb   : > { %v270_v0 = vld [vmem:[%s1071_s1] sm:$0xf]  ;;  %v278_v1 = vlaneseq  ;;  %v886_v2 = vmov 0   ;;  %s1078_s22 = smov (!%p249_p3, %s833_s22), 1  ;;  %v888_v26 = vmov 839922192  }
   0xc   : > { %877 = vset.pattern.permute.xlu0 %v886_v2  ;;  %v266_v3 = vld [vmem:[%s1073_s3] sm:$0xf]  ;;  %544 = vmatprep.mubr.bf16.mxu0 %v886_v2  ;;  %v276_v27 = vunpack.c.l.s4 %v888_v26  ;;  %s962_s30 = sshll.u32 %s1078_s22, 2  ;;  %vm310_vm7 = vcmask 138240   ;;  %vm452_vm9 = vcmask 146432   ;;  %vm617_vm13 = vcmask 277504  }
   0xd   : > { %273 = vperm.xlu0 %877, %v270_v0   ;;  %v279_v4 = vshrl.u32 %v278_v1, 7  ;;  %vm267_vm0 = vcmp.gt.f32.partialorder %v266_v3, 0.5  ;;  %592 = vmatprep.mubr.bf16.mxu1 %v886_v2  ;;  %v284_v5 = vld [vmem:[%s1072_s2] sm:$0xf]  ;;  %s253_s9 = scalar_lea.vmem %s1070_s0, %s962_s30  ;;  %vm440_vm15 = vcmask 130048   ;;  %s258_s28 = scalar_lea.vmem %s1075_s5, %s962_s30 }
   0xe   : > { %v321_v6 = vsel %vm267_vm0, 1, %v886_v2  ;;  %v277_v28 = vunpack.c.0.s8 %v276_v27  ;;  %v268_v30 = vld [vmem:[%s253_s9] sm:$0xf]  ;;  %s262_s8 = scalar_lea.vmem %s1076_s6, %s962_s30 }
   0xf   : > { %v356_v7 = vsub.s32 1, %v279_v4  ;;  %v360_v8 = vsub.s32 3, %v279_v4  ;;  %v324_v11 = vsub.s32 0, %v279_v4  ;;  %v328_v12 = vsub.s32 2, %v279_v4 }
  0x10   : > { %v348_v17 = vsub.s32 4, %v279_v4  ;;  %v280_v29 = vsub.s32 %v277_v28, %v279_v4  ;;  %v269_v32 = vunpack.c.l.bf16 %v268_v30 }
  0x11   : > { %287 = vperm.xlu0 %877, %v284_v5   ;;  %v357_v9 = vrot.slane %v321_v6, %v356_v7  ;;  %v361_v10 = vrot.slane %v321_v6, %v360_v8  ;;  %v325_v15 = vrot.slane %v321_v6, %v324_v11  ;;  %v329_v16 = vrot.slane %v321_v6, %v328_v12 }
  0x13   : > { %v365_v13 = vrot.slane %v357_v9, %v356_v7  ;;  %v369_v14 = vrot.slane %v361_v10, %v356_v7  ;;  %v333_v18 = vrot.slane %v325_v15, %v324_v11  ;;  %v337_v19 = vrot.slane %v329_v16, %v324_v11 }
  0x15   : > { %vm370_vm1 = vcmp.eq.s32.totalorder %v365_v13, 1  ;;  %vm371_vm2 = vcmp.eq.s32.totalorder %v369_v14, 1  ;;  %vm338_vm4 = vcmp.eq.s32.totalorder %v333_v18, 1  ;;  %vm339_vm5 = vcmp.eq.s32.totalorder %v337_v19, 1 }
  0x16   : > { %vm372_vm3 = vmpackc.low %vm371_vm2, %vm370_vm1  ;;  %vm386_vm2 = vcmask 15360  }
  0x17   : > { %v373_v20 = vsel %vm372_vm3, 65537, %v886_v2  ;;  %vm340_vm6 = vmpackc.low %vm339_vm5, %vm338_vm4 }
  0x18   : > { %v377_v21 = vrot.slane %v373_v20, %v324_v11  ;;  %v381_v22 = vrot.slane %v373_v20, %v348_v17  ;;  %v341_v23 = vsel %vm340_vm6, 65537, %v886_v2  ;;  %vm405_vm6 = vcmask 1039360  }
  0x19   : > { %v345_v24 = vrot.slane %v341_v23, %v324_v11  ;;  %v956_v25 = vrot.slane %v341_v23, %v348_v17 }
  0x1a   : > { %448 = vrot.lane.b32.xlu1 %v377_v21, %s887_s29 }
  0x1b   : > { %vm350_vm8 = vcmp.ne.s16.totalorder %v345_v24, 0 }
  0x1e   : > { %450 = vrot.lane.b32.xlu1 %v381_v22, %s887_s29 }
  0x88   : > { %v274_v31 = vpop.permute.xlu0 %273 }
  0x89   : > { %v281_v33 = vrot.slane %v274_v31, %v280_v29 }
  0x8b   : > { %v283_v35 = vmul.f32 %v281_v33, %v269_v32 }
  0x8c   : > { %v288_v34 = vpop.permute.xlu0 %287  ;;  %v449_v42 = vpop.permute.xlu1 %448 }
  0x8d   : > { %v295_v36 = vrot.slane %v288_v34, %v280_v29  ;;  %vm454_vm10 = vcmp.ne.s16.totalorder %v449_v42, 0 }
  0x8f   : > { %v297_v37 = vadd.f32 %v295_v36, %v283_v35 }
  0x90   : > { %v451_v43 = vpop.permute.xlu1 %450 }
  0x91   : > { %v298_v38 = vmax.f32 %v297_v37, 0.0  ;;  %v453_v50 = vsel %vm452_vm9, %v449_v42, %v451_v43  ;;  %vm456_vm11 = vcmp.ne.s16.totalorder %v451_v43, 0  ;;  %vm423_vm9 = vcmask 1041408  }
  0x92   : > { %vm455_vm12 = vcmp.ne.s16.totalorder %v453_v50, 0 }
  0x93   : > { %v302_v39 = vpack.c.bf16 %v298_v38, %v298_v38  ;;  %v300_v40 = vcombine.high %v298_v38, %v298_v38 }
  0x95   : > { %306 = vrot.lane.b32.xlu0 %v302_v39, %s889_s10  ;;  %v303_v41 = vpack.c.bf16 %v300_v40, %v300_v40 }
  0x97   : > { %308 = vrot.lane.b32.xlu1 %v303_v41, %s889_s10 }
  0x99   : > { %613 = vrot.lane.b32.xlu0 %v377_v21, %s890_s11 }
  0x9b   : > { %615 = vrot.lane.b32.xlu1 %v381_v22, %s890_s11 }
  0x9d   : > { %436 = vrot.lane.b32.xlu0 %v345_v24, %s891_s12 }
  0x9f   : > { %438 = vrot.lane.b32.xlu1 %v956_v25, %s891_s12 }
  0xa1   : > { %382 = vrot.lane.b32.xlu0 %v377_v21, %s892_s13 }
  0xa3   : > { %384 = vrot.lane.b32.xlu1 %v381_v22, %s892_s13 }
  0xa5   : > { %601 = vrot.lane.b32.xlu0 %v345_v24, %s893_s14 }
 0x107   : > { %v307_v44 = vpop.permute.xlu0 %306 }
 0x108   : > { %v970_v45 = vsel %vm310_vm7, 0, %v307_v44 }
 0x109   : > { %v309_v46 = vpop.permute.xlu1 %308  ;;  %v396_v47 = vrot.slane %v970_v45, 6  ;;  %v457_v48 = vsel %vm454_vm10, %v970_v45, 0  ;;  %v975_v49 = vsel %vm350_vm8, %v970_v45, 0 }
 0x10a   : > { %v977_v51 = vsel %vm310_vm7, %v309_v46, 0  ;;  %v463_v52 = vrot.slane %v457_v48, 4  ;;  %v979_v53 = vsel %vm310_vm7, %v307_v44, %v309_v46  ;;  %vm351_vm7 = vcmp.ne.s16.totalorder %v956_v25, 0 }
 0x10b   : > { %399 = vrot.lane.b32.xlu0 %v396_v47, %s894_s15  ;;  %v614_v54 = vpop.permute.xlu0 %613  ;;  %v398_v56 = vrot.slane %v977_v51, 6  ;;  %v397_v57 = vrot.slane %v979_v53, 6  ;;  %v458_v58 = vsel %vm455_vm12, %v979_v53, 0  ;;  %v459_v60 = vsel %vm456_vm11, %v977_v51, 0 }
 0x10c   : > { %466 = vrot.lane.b32.xlu1 %v463_v52, %s895_s16  ;;  %vm619_vm14 = vcmp.ne.s16.totalorder %v614_v54, 0  ;;  %v464_v0 = vrot.slane %v458_v58, 4  ;;  %v465_v4 = vrot.slane %v459_v60, 4  ;;  %v353_v24 = vsel %vm351_vm7, %v979_v53, 0 }
 0x10d   : > { %v616_v55 = vpop.permute.xlu1 %615  ;;  %v622_v1 = vsel %vm619_vm14, %v970_v45, 0  ;;  %vm420_vm12 = vcmask 1031168   ;;  %vm605_vm14 = vcmask 261120   ;;  %vm745_vm7 = vcmask 11264  }
 0x10e   : > { %v618_v61 = vsel %vm617_vm13, %v614_v54, %v616_v55  ;;  %vm621_vm1 = vcmp.ne.s16.totalorder %v616_v55, 0  ;;  %v628_v6 = vrot.slane %v622_v1, 4  ;;  %vm430_vm13 = vcmask 1043456  }
 0x10f   : > { %v437_v59 = vpop.permute.xlu0 %436  ;;  %403 = vrot.lane.b32.xlu0 %v398_v56, %s894_s15  ;;  %vm620_vm3 = vcmp.ne.s16.totalorder %v618_v61, 0  ;;  %v624_v8 = vsel %vm621_vm1, %v977_v51, 0 }
 0x110   : > { %vm442_vm0 = vcmp.ne.s16.totalorder %v437_v59, 0  ;;  %401 = vrot.lane.b32.xlu1 %v397_v57, %s894_s15  ;;  %v623_v10 = vsel %vm620_vm3, %v979_v53, 0  ;;  %v630_v11 = vrot.slane %v624_v8, 4  ;;  %vm505_vm3 = vcmask 1045504  }
 0x111   : > { %v987_v62 = vsel %vm442_vm0, %v970_v45, 0  ;;  %v439_v63 = vpop.permute.xlu1 %438  ;;  %v629_v12 = vrot.slane %v623_v10, 4 }
 0x112   : > { %v441_v3 = vsel %vm440_vm15, %v437_v59, %v439_v63  ;;  %vm444_vm8 = vcmp.ne.s16.totalorder %v439_v63, 0 }
 0x113   : > { %468 = vrot.lane.b32.xlu0 %v464_v0, %s895_s16  ;;  %v383_v5 = vpop.permute.xlu0 %382  ;;  %vm443_vm10 = vcmp.ne.s16.totalorder %v441_v3, 0  ;;  %v447_v27 = vsel %vm444_vm8, %v977_v51, 0 }
 0x114   : > { %470 = vrot.lane.b32.xlu1 %v465_v4, %s895_s16  ;;  %vm388_vm4 = vcmp.ne.s16.totalorder %v383_v5, 0  ;;  %v446_v29 = vsel %vm443_vm10, %v979_v53, 0 }
 0x115   : > { %v385_v7 = vpop.permute.xlu1 %384  ;;  %v391_v13 = vsel %vm388_vm4, %v970_v45, 0  ;;  %vm501_vm4 = vcmask 97280  }
 0x116   : > { %v387_v9 = vsel %vm386_vm2, %v383_v5, %v385_v7  ;;  %v411_v15 = vrot.slane %v391_v13, 4  ;;  %vm390_vm11 = vcmp.ne.s16.totalorder %v385_v7, 0  ;;  %vm498_vm2 = vcmask 916480   ;;  %v843_v7 = vld [vmem:[%s1074_s4 + $0x2] sm:$0x3] }
 0x117   : > { %631 = vrot.lane.b32.xlu0 %v628_v6, %s895_s16  ;;  %vm389_vm5 = vcmp.ne.s16.totalorder %v387_v9, 0  ;;  %v602_v17 = vpop.permute.xlu0 %601  ;;  %v393_v32 = vsel %vm390_vm11, %v977_v51, 0 }
 0x118   : > { %603 = vrot.lane.b32.xlu1 %v956_v25, %s893_s14  ;;  %v392_v14 = vsel %vm389_vm5, %v979_v53, 0  ;;  %v413_v39 = vrot.slane %v393_v32, 4  ;;  %vm607_vm15 = vcmp.ne.s16.totalorder %v602_v17, 0  ;;  %vm662_vm5 = vcmask 785408  }
 0x119   : > { %v412_v16 = vrot.slane %v392_v14, 4  ;;  %v610_v47 = vsel %vm607_vm15, %v970_v45, 0 }
 0x11b   : > { %635 = vrot.lane.b32.xlu0 %v630_v11, %s895_s16  ;;  %v435_v11 = vld [vmem:[%s1074_s4] sm:$0x3] }
 0x11c   : > { %633 = vrot.lane.b32.xlu1 %v629_v12, %s895_s16 }
 0x11f   : > { %414 = vrot.lane.b32.xlu0 %v411_v15, %s895_s16 }
 0x120   : > { %416 = vrot.lane.b32.xlu1 %v412_v16, %s895_s16  ;;  %v848_v16 = vld [vmem:[%s1074_s4 + $0x4] sm:$0x3] }
 0x17d   : > { %v400_v18 = vpop.permute.xlu0 %399 }
 0x17e   : > { %v467_v19 = vpop.permute.xlu1 %466 }
 0x181   : > { %v404_v20 = vpop.permute.xlu0 %403 }
 0x182   : > { %v402_v21 = vpop.permute.xlu1 %401  ;;  %v480_v30 = vsel %vm423_vm9, %v447_v27, %v404_v20 }
 0x183   : > { %v406_v22 = vsel %vm405_vm6, %v400_v18, %v402_v21  ;;  %v407_v23 = vsel %vm405_vm6, %v402_v21, %v404_v20  ;;  %vm743_vm6 = vcmask 7168  }
 0x184   : > { %v429_v26 = vsel %vm423_vm9, %v353_v24, %v407_v23  ;;  %v426_v25 = vsel %vm423_vm9, %v975_v49, %v406_v22  ;;  %v477_v35 = vsel %vm423_vm9, %v446_v29, %v407_v23  ;;  %v475_v41 = vsel %vm423_vm9, %v987_v62, %v406_v22 }
 0x185   : > { %v469_v28 = vpop.permute.xlu0 %468  ;;  %v640_v55 = vsel %vm423_vm9, %v610_v47, %v406_v22 }
 0x186   : > { %v471_v31 = vpop.permute.xlu1 %470  ;;  %v472_v36 = vsel %vm420_vm12, %v467_v19, %v469_v28 }
 0x187   : > { %v473_v33 = vsel %vm420_vm12, %v469_v28, %v471_v31  ;;  %v486_v34 = vsel %vm430_vm13, %v480_v30, %v471_v31  ;;  %v482_v43 = vsel %vm430_vm13, %v475_v41, %v472_v36 }
 0x188   : > { %496 = vrot.lane.b32.xlu1 %v486_v34, %s896_s17  ;;  %v484_v37 = vsel %vm430_vm13, %v477_v35, %v473_v33 }
 0x189   : > { %v632_v38 = vpop.permute.xlu0 %631  ;;  %494 = vrot.lane.b32.xlu0 %v484_v37, %s896_s17 }
 0x18a   : > { %v604_v40 = vpop.permute.xlu1 %603 }
 0x18b   : > { %v606_v42 = vsel %vm605_vm14, %v602_v17, %v604_v40  ;;  %vm609_vm0 = vcmp.ne.s16.totalorder %v604_v40, 0 }
 0x18c   : > { %vm608_vm1 = vcmp.ne.s16.totalorder %v606_v42, 0  ;;  %492 = vrot.lane.b32.xlu1 %v482_v43, %s896_s17  ;;  %v612_v48 = vsel %vm609_vm0, %v977_v51, 0 }
 0x18d   : > { %v611_v44 = vsel %vm608_vm1, %v979_v53, 0  ;;  %v636_v46 = vpop.permute.xlu0 %635  ;;  %418 = vrot.lane.b32.xlu0 %v413_v39, %s895_s16  ;;  %v644_v45 = vsel %vm423_vm9, %v612_v48, %v404_v20 }
 0x18e   : > { %v634_v49 = vpop.permute.xlu1 %633  ;;  %v642_v50 = vsel %vm423_vm9, %v611_v44, %v407_v23  ;;  %v650_v51 = vsel %vm430_vm13, %v644_v45, %v636_v46 }
 0x18f   : > { %v637_v52 = vsel %vm420_vm12, %v632_v38, %v634_v49  ;;  %v638_v54 = vsel %vm420_vm12, %v634_v49, %v636_v46 }
 0x190   : > { %v648_v56 = vsel %vm430_vm13, %v642_v50, %v638_v54  ;;  %v646_v53 = vsel %vm430_vm13, %v640_v55, %v637_v52 }
 0x191   : > { %658 = vrot.lane.b32.xlu0 %v648_v56, %s897_s18  ;;  %656 = vrot.lane.b32.xlu1 %v646_v53, %s897_s18  ;;  %v415_v58 = vpop.permute.xlu0 %414 }
 0x192   : > { %v417_v57 = vpop.permute.xlu1 %416 }
 0x193   : > { %v421_v61 = vsel %vm420_vm12, %v415_v58, %v417_v57 }
 0x194   : > { %v432_v3 = vsel %vm430_vm13, %v426_v25, %v421_v61 }
 0x195   : > { %660 = vrot.lane.b32.xlu1 %v650_v51, %s897_s18  ;;  %v556_v8 = vsel %vm505_vm3, %v432_v3, 0 }
 0x1fa   : > { %v497_v59 = vpop.permute.xlu1 %496 }
 0x1fb   : > { %v495_v60 = vpop.permute.xlu0 %494 }
 0x1fc   : > { %v500_v62 = vsel %vm498_vm2, %v495_v60, %v497_v59 }
 0x1fd   : > { %844 = vmatprep.subr.msk.bf16.mxu0 %vm505_vm3, %v500_v62 }
 0x1fe   : > { %v493_v63 = vpop.permute.xlu1 %492 }
 0x1ff   : > { %v419_v0 = vpop.permute.xlu0 %418  ;;  %v499_v1 = vsel %vm498_vm2, %v493_v63, %v495_v60 }
 0x200   : > { %v422_v4 = vsel %vm420_vm12, %v417_v57, %v419_v0  ;;  %v507_v5 = vsel %vm505_vm3, %v499_v1, 0 }
 0x201   : > { %527 = vmatpush1.bf16.msra.mxu0 %v507_v5  ;;  %v434_v6 = vsel %vm430_vm13, %v429_v26, %v422_v4 }
 0x202   : > { %846 = vmatprep.subr.msk.bf16.mxu1 %vm505_vm3, %v434_v6 }
 0x203   : > { %v659_v9 = vpop.permute.xlu0 %658  ;;  %575 = vmatpush1.bf16.msra.mxu1 %v556_v8  ;;  %v657_v10 = vpop.permute.xlu1 %656 }
 0x204   : > { %845 = vmatmul.mubr.msk.bf16.vlgmr.msra.gmra.mxu0 %vm501_vm4, %v843_v7  ;;  %v663_v12 = vsel %vm662_vm5, %v657_v10, %v659_v9 }
 0x205   : > { %706 = vmatprep.mubr.bf16.mxu0 %v886_v2  ;;  %v669_v15 = vsel %vm505_vm3, %v663_v12, 0 }
 0x206   : > { %847 = vmatmul.mubr.msk.bf16.vlgmr.msra.gmra.mxu1 %vm501_vm4, %v435_v11 }
 0x207   : > { %v661_v13 = vpop.permute.xlu1 %660 }
 0x208   : > { %v664_v14 = vsel %vm662_vm5, %v659_v9, %v661_v13 }
 0x209   : > { %849 = vmatprep.subr.msk.bf16.mxu0 %vm505_vm3, %v664_v14 }
 0x20a   : > { %689 = vmatpush1.bf16.msra.mxu0 %v669_v15 }
 0x20d   : > { %850 = vmatmul.mubr.msk.bf16.vlgmr.msra.gmra.mxu0 %vm501_vm4, %v848_v16 }
 0x2c4   : > { %v546_v17 = vpop.f32.mrf.mxu0 }
 0x2c6   : > { %v548_v18 = vpop.f32.mrf.mxu0  ;;  %v594_v2 = vpop.f32.mrf.mxu1 }
 0x2c7   : > { %v595_v23 = vadd.f32 %v594_v2, %v546_v17 }
 0x2c8   : > { %v550_v19 = vpop.f32.mrf.mxu0  ;;  %v596_v20 = vpop.f32.mrf.mxu1 }
 0x2c9   : > { %v597_v27 = vadd.f32 %v596_v20, %v548_v18 }
 0x2ca   : > { %v551_v21 = vpop.f32.mrf.mxu0  ;;  %v598_v22 = vpop.f32.mrf.mxu1 }
 0x2cc   : > { %v599_v24 = vpop.f32.mrf.mxu1 }
 0x2cd   : > { %v708_v26 = vpop.f32.mrf.mxu0 }
 0x2ce   : > { %v715_v28 = vadd.f32 %v708_v26, %v595_v23 }
 0x2cf   : > { %v710_v25 = vpop.f32.mrf.mxu0 }
 0x2d0   : > { %v716_v29 = vadd.f32 %v710_v25, %v597_v27  ;;  %v736_v30 = vmul.f32 %v715_v28, %v715_v28  ;;  %v731_v33 = vsel %vm430_vm13, %v715_v28, 0.0 }
 0x2d1   : > { %v712_v31 = vpop.f32.mrf.mxu0 }
 0x2d2   : > { %v851_v32 = vpack.c.bf16 %v716_v29, %v715_v28  ;;  %v732_v34 = vsel %vm430_vm13, %v716_v29, 0.0  ;;  %v737_v35 = vmul.f32 %v716_v29, %v716_v29  ;;  %v738_v38 = vsel %vm430_vm13, %v736_v30, 0.0 }
 0x2d3   : > { %v713_v36 = vpop.f32.mrf.mxu0  ;;  %v733_v37 = vadd.f32 %v732_v34, %v731_v33 }
 0x2d4   : > { %852 = vst.sshfl [vmem:[%s258_s28] sm:$0x33 pattern:$0x76325410] %v851_v32  ;;  %v739_v39 = vsel %vm430_vm13, %v737_v35, 0.0 }
 0x2d5   : > { %734 = vadd.xlane.f32.xlu0 %v733_v37  ;;  %v740_v40 = vadd.f32 %v739_v39, %v738_v38 }
 0x2d7   : > { %741 = vadd.xlane.f32.xlu1 %v740_v40 }
 0x35e   : > { %v735_v41 = vpop.xlane.xlu0 %734 }
 0x360   : > { %v742_v42 = vpop.xlane.xlu1 %741 }
 0x361   : > { %v744_v43 = vsel %vm743_vm6, %v735_v41, %v742_v42 }
 0x362   : > { %746 = vst.msk [vmem:[%s262_s8] sm:$0xf] %vm745_vm7, %v744_v43 }
 0x363 PF: > { %s17_s21 = sadd.s32 1, %s884_s21  }
 0x364   : > { %p14_p4 = scmp.ge.s32.totalorder %s17_s21, 4  }
 0x366   :  { %16 = sbr.rel (!%p14_p4) target bundleno = 1 (0x1), region = 84 }

// kernel: decoder_block.3
= control target key start
LH: loop header
LB: loop body
LE: loop exit
PB: predicated region body
PF: predicated region fallthrough
CT: control target
= control target key end

     0   :  { %s1730_s27 = smov 0   ;;  %s2020_s0 = inlined_call_operand.vmem [shape: f32[2,4,64], index: 0, kind: input, shape index: {}]   ;;  %s2021_s1 = inlined_call_operand.vmem [shape: f32[2,4,256], index: 1, kind: input, shape index: {}]   ;;  %s2022_s2 = inlined_call_operand.vmem [shape: bf16[4,4,4], index: 2, kind: input, shape index: {}]   ;;  %s2023_s3 = inlined_call_operand.vmem [shape: f32[4,1], index: 3, kind: input, shape index: {}]   ;;  %s2024_s4 = inlined_call_operand.vmem [shape: bf16[4,64,256], index: 4, kind: input, shape index: {}]   ;;  %s2025_s5 = inlined_call_operand.vmem [shape: f32[2,256], index: 5, kind: input, shape index: {}]   ;;  %s2026_s6 = inlined_call_operand.vmem [shape: bf16[3,4,24], index: 6, kind: input, shape index: {}]   ;;  %s2027_s7 = inlined_call_operand.vmem [shape: bf16[2,4,256], index: 7, kind: output, shape index: {0}]   ;;  %s2028_s8 = inlined_call_operand.vmem [shape: f32[2,4,2], index: 8, kind: output, shape index: {1}]  }
   0x1 LB: > { %s1469_s28 = sadd.s32 4294967295, %s1670_s27   ;;  %p1473_p0 = scmp.ge.s32.totalorder %s1670_s27, 1  ;;  %s1670_s27 = sphi %s1730_s27, %s19_s27  }
   0x2   : > { %p274_p1 = scmp.lt.s32.totalorder %s1670_s27, 3 }
   0x4   : > { %p275_p2 = pnand %p1473_p0, %p274_p1 }
   0x5   : > { %p316_p3 = scmp.lt.s32.totalorder (!%p275_p2), %s1469_s28, 1  ;;  %s1675_s11 = smov (!%p275_p2), 18  }
   0x6   : > { %278 = sbr.rel (%p275_p2) target bundleno = 1351 (0x547), region = 48  ;;  %s1677_s16 = smov (!%p275_p2), 34  }
   0x7   : > { %s1678_s17 = smov (!%p275_p2), 16   ;;  %s1679_s18 = smov (!%p275_p2), 2  }
   0x8   : > { %s1680_s19 = smov (!%p275_p2), 126   ;;  %s1681_s20 = smov (!%p275_p2), 127  }
   0x9   : > { %s1682_s21 = smov (!%p275_p2), 32   ;;  %s1683_s22 = smov (!%p275_p2), 112  }
   0xa   : > { %s1684_s23 = smov (!%p275_p2), 96  }
   0xb   : > { %v1672_v0 = vmov 0.0   ;;  %s2030_s28 = smov (!%p316_p3, %s1469_s28), 1  ;;  %vm1673_vm0 = vmmov 0   ;;  %vm346_vm1 = vcmask 1041408   ;;  %v1617_v2 = vld [vmem:[%s2024_s4 + $0x74] ss:$8 sps:$4 sm:$0xff]  }
   0xc   : > { %1569 = vmatprep.subr.bf16.mxu0 %v1672_v0  ;;  %1575 = vmatprep.subr.bf16.mxu1 %v1672_v0  ;;  %s1747_s29 = sshll.u32 %s2030_s28, 2  ;;  %v1620_v4 = vld [vmem:[%s2024_s4 + $0x34] ss:$8 sps:$4 sm:$0xff]   ;;  %v341_v5 = vld [vmem:[%s2022_s2] sm:$0x3]  ;;  %vm342_vm2 = vcmask 31744  }
   0xd   : > { %1571 = vmatprep.mubr.msk.bf16.mxu0 %vm1673_vm0, %v1672_v0  ;;  %1577 = vmatprep.mubr.msk.bf16.mxu1 %vm1673_vm0, %v1672_v0  ;;  %s319_s10 = scalar_lea.vmem %s2020_s0, %s1747_s29  ;;  %v1481_v7 = vld [vmem:[%s2022_s2 + $0x2] sm:$0x3]  ;;  %v1615_v8 = vld [vmem:[%s2024_s4 + $0x70] ss:$8 sps:$4 sm:$0xff]   ;;  %v1623_v10 = vld [vmem:[%s2024_s4 + $0x64] ss:$8 sps:$4 sm:$0xff]   ;;  %s329_s13 = scalar_lea.vmem %s2027_s7, %s1747_s29 }
   0xe   : > { %v339_v1 = vld [vmem:[%s319_s10] sm:$0xf]  ;;  %v1618_v9 = vld [vmem:[%s2024_s4 + $0x30] ss:$8 sps:$4 sm:$0xff]   ;;  %v1626_v11 = vld [vmem:[%s2024_s4 + $0x24] ss:$8 sps:$4 sm:$0xff]  }
   0xf   : > { %v340_v3 = vpack.c.bf16 %v339_v1, %v339_v1  ;;  %v1621_v12 = vld [vmem:[%s2024_s4 + $0x60] ss:$8 sps:$4 sm:$0xff]   ;;  %v1629_v14 = vld [vmem:[%s2024_s4 + $0x54] ss:$8 sps:$4 sm:$0xff]   ;;  %v1627_v16 = vld [vmem:[%s2024_s4 + $0x50] ss:$8 sps:$4 sm:$0xff]  }
  0x10   : > { %v1624_v13 = vld [vmem:[%s2024_s4 + $0x20] ss:$8 sps:$4 sm:$0xff]   ;;  %v1632_v15 = vld [vmem:[%s2024_s4 + $0x14] ss:$8 sps:$4 sm:$0xff]   ;;  %v1630_v17 = vld [vmem:[%s2024_s4 + $0x10] ss:$8 sps:$4 sm:$0xff]  }
  0x11   : > { %v1763_v6 = vsel %vm346_vm1, %v340_v3, 0  ;;  %v1635_v18 = vld [vmem:[%s2024_s4 + $0x44] ss:$8 sps:$4 sm:$0xff]   ;;  %v1633_v20 = vld [vmem:[%s2024_s4 + $0x40] ss:$8 sps:$4 sm:$0xff]   ;;  %v1674_v22 = vmov 0  }
  0x12   : > { %1570 = vmatpush3.bf16.msra.mxu0 %v1763_v6  ;;  %1576 = vmatpush3.bf16.msra.mxu1 %v1763_v6  ;;  %v1638_v19 = vld [vmem:[%s2024_s4 + $0x4] ss:$8 sps:$4 sm:$0xff]   ;;  %v1636_v21 = vld [vmem:[%s2024_s4] ss:$8 sps:$4 sm:$0xff]   ;;  %v1641_v23 = vld [vmem:[%s2024_s4 + $0xb4] ss:$8 sps:$4 sm:$0xff]  }
  0x13   : > { %506 = vmatprep.subr.bf16.mxu0 %v1617_v2  ;;  %590 = vmatprep.subr.bf16.mxu1 %v1620_v4  ;;  %vm494_vm3 = vcmask 523264   ;;  %v1639_v28 = vld [vmem:[%s2024_s4 + $0xb0] ss:$8 sps:$4 sm:$0xff]   ;;  %v1644_v31 = vld [vmem:[%s2024_s4 + $0xa4] ss:$8 sps:$4 sm:$0xff]   ;;  %s1559_s12 = sshll.u32 %s2030_s28, 3 }
  0x14   : > { %1614 = vset.pattern.permute.xlu0 %v1674_v22  ;;  %v1642_v34 = vld [vmem:[%s2024_s4 + $0xa0] ss:$8 sps:$4 sm:$0xff]   ;;  %v1509_v37 = vld [vmem:[%s2022_s2 + $0x4] sm:$0x3]  ;;  %v1528_v38 = vld [vmem:[%s2022_s2 + $0x6] sm:$0x3]  ;;  %s324_s15 = scalar_lea.vmem %s2021_s1, %s1559_s12 }
  0x15   : > { %1572 = vmatmul.mubr.msk.bf16.vlgmr.msra.gmra.mxu0 %vm342_vm2, %v341_v5  ;;  %1578 = vmatmul.mubr.msk.bf16.vlgmr.msra.gmra.mxu1 %vm342_vm2, %v1481_v7  ;;  %v1647_v39 = vld [vmem:[%s2024_s4 + $0x94] ss:$8 sps:$4 sm:$0xff]   ;;  %v1645_v41 = vld [vmem:[%s2024_s4 + $0x90] ss:$8 sps:$4 sm:$0xff]   ;;  %v1653_v43 = vld [vmem:[%s2024_s4 + $0x84] ss:$8 sps:$4 sm:$0xff]  }
  0x16   : > { %507 = vmatpush1.bf16.msra.mxu0 %v1615_v8  ;;  %591 = vmatpush1.bf16.msra.mxu1 %v1618_v9  ;;  %v1650_v40 = vld [vmem:[%s2024_s4 + $0xf4] ss:$8 sps:$4 sm:$0xff]   ;;  %v1648_v42 = vld [vmem:[%s2024_s4 + $0xf0] ss:$8 sps:$4 sm:$0xff]   ;;  %v1656_v44 = vld [vmem:[%s2024_s4 + $0xe4] ss:$8 sps:$4 sm:$0xff]   ;;  %v949_v8 = vlaneseq }
  0x17   : > { %508 = vmatprep.subr.bf16.mxu0 %v1623_v10  ;;  %592 = vmatprep.subr.bf16.mxu1 %v1626_v11  ;;  %v1651_v45 = vld [vmem:[%s2024_s4 + $0x80] ss:$8 sps:$4 sm:$0xff]   ;;  %v1659_v47 = vld [vmem:[%s2024_s4 + $0xd4] ss:$8 sps:$4 sm:$0xff]   ;;  %v1657_v48 = vld [vmem:[%s2024_s4 + $0xd0] ss:$8 sps:$4 sm:$0xff]  }
  0x18   : > { %530 = vmatprep.mubr.bf16.mxu0 %v1674_v22  ;;  %614 = vmatprep.mubr.bf16.mxu1 %v1674_v22  ;;  %v1654_v46 = vld [vmem:[%s2024_s4 + $0xe0] ss:$8 sps:$4 sm:$0xff]   ;;  %v1662_v49 = vld [vmem:[%s2024_s4 + $0xc4] ss:$8 sps:$4 sm:$0xff]   ;;  %v950_v9 = vshrl.u32 %v949_v8, 7  ;;  %s1676_s28 = smov 17  }
  0x19   : > { %v1660_v50 = vld [vmem:[%s2024_s4 + $0xc0] ss:$8 sps:$4 sm:$0xff]   ;;  %vm937_vm11 = vcmask 138240   ;;  %vm1073_vm13 = vcmask 146432  }
  0x1a   : > { %509 = vmatpush1.bf16.msra.mxu0 %v1621_v12  ;;  %593 = vmatpush1.bf16.msra.mxu1 %v1624_v13  ;;  %v905_v51 = vld [vmem:[%s2023_s3] sm:$0xf]  ;;  %v983_v11 = vsub.s32 1, %v950_v9  ;;  %v987_v12 = vsub.s32 3, %v950_v9 }
  0x1b   : > { %510 = vmatprep.subr.bf16.mxu0 %v1629_v14  ;;  %594 = vmatprep.subr.bf16.mxu1 %v1632_v15  ;;  %v337_v10 = vld [vmem:[%s2025_s5] sm:$0xf] }
  0x1c   : > { %908 = vperm.xlu0 %1614, %v905_v51   ;;  %vm338_vm4 = vcmp.gt.f32.partialorder %v337_v10, 0.5 }
  0x1d   : > { %v948_v13 = vsel %vm338_vm4, 1, %v1674_v22 }
  0x1e   : > { %511 = vmatpush1.bf16.msra.mxu0 %v1627_v16  ;;  %595 = vmatpush1.bf16.msra.mxu1 %v1630_v17  ;;  %v984_v14 = vrot.slane %v948_v13, %v983_v11  ;;  %v988_v15 = vrot.slane %v948_v13, %v987_v12 }
  0x1f   : > { %512 = vmatprep.subr.bf16.mxu0 %v1635_v18  ;;  %596 = vmatprep.subr.bf16.mxu1 %v1638_v19  ;;  %v975_v18 = vsub.s32 4, %v950_v9  ;;  %v951_v19 = vsub.s32 0, %v950_v9 }
  0x20   : > { %v992_v16 = vrot.slane %v984_v14, %v983_v11  ;;  %v996_v17 = vrot.slane %v988_v15, %v983_v11 }
  0x22   : > { %513 = vmatpush1.bf16.msra.mxu0 %v1633_v20  ;;  %597 = vmatpush1.bf16.msra.mxu1 %v1636_v21  ;;  %vm997_vm5 = vcmp.eq.s32.totalorder %v992_v16, 1  ;;  %vm998_vm6 = vcmp.eq.s32.totalorder %v996_v17, 1 }
  0x23   : > { %1581 = vmatprep.subr.bf16.mxu0 %v1672_v0  ;;  %729 = vmatprep.subr.bf16.mxu1 %v1641_v23  ;;  %vm999_vm7 = vmpackc.low %vm998_vm6, %vm997_vm5  ;;  %vm1013_vm5 = vcmask 15360  }
  0x24   : > { %v1000_v20 = vsel %vm999_vm7, 65537, %v1674_v22 }
  0x25   : > { %v1008_v21 = vrot.slane %v1000_v20, %v975_v18  ;;  %v1004_v23 = vrot.slane %v1000_v20, %v951_v19 }
  0x27   : > { %1071 = vrot.lane.b32.xlu1 %v1008_v21, %s1675_s11  ;;  %1069 = vrot.lane.b32.xlu0 %v1004_v23, %s1675_s11 }
  0xd5   : > { %v384_v24 = vpop.f32.mrf.mxu0  ;;  %v438_v25 = vpop.f32.mrf.mxu1 }
  0xd6   : > { %v390_v26 = vpack.c.bf16 %v384_v24, %v384_v24  ;;  %v444_v27 = vpack.c.bf16 %v438_v25, %v438_v25  ;;  %v955_v24 = vsub.s32 2, %v950_v9  ;;  %v952_v25 = vrot.slane %v948_v13, %v951_v19 }
  0xd7   : > { %v1579_v29 = vpop.f32.mrf.mxu1  ;;  %v1573_v30 = vpop.f32.mrf.mxu0 }
  0xd8   : > { %1499 = vmatmul.mubr.msk.bf16.vlgmr.msra.gmra.mxu0 %vm494_vm3, %v444_v27  ;;  %1508 = vmatmul.mubr.msk.bf16.vlgmr.msra.gmra.mxu1 %vm494_vm3, %v390_v26  ;;  %v956_v26 = vrot.slane %v948_v13, %v955_v24  ;;  %v960_v27 = vrot.slane %v952_v25, %v951_v19 }
  0xd9   : > { %v441_v32 = vpop.f32.mrf.mxu1  ;;  %1582 = vmatpush3.bf16.msra.mxu0 %v1763_v6  ;;  %1583 = vmatprep.mubr.msk.bf16.mxu0 %vm1673_vm0, %v1672_v0  ;;  %v387_v33 = vpop.f32.mrf.mxu0 }
  0xda   : > { %1587 = vmatprep.subr.bf16.mxu0 %v1672_v0  ;;  %730 = vmatpush1.bf16.msra.mxu1 %v1639_v28  ;;  %v964_v28 = vrot.slane %v956_v26, %v951_v19  ;;  %vm965_vm8 = vcmp.eq.s32.totalorder %v960_v27, 1 }
  0xdb   : > { %v1580_v35 = vpop.f32.mrf.mxu1  ;;  %v1574_v36 = vpop.f32.mrf.mxu0  ;;  %731 = vmatprep.subr.bf16.mxu1 %v1644_v31  ;;  %753 = vmatprep.mubr.bf16.mxu1 %v1674_v22 }
  0xdc   : > { %vm966_vm9 = vcmp.eq.s32.totalorder %v964_v28, 1 }
  0xdd   : > { %vm967_vm10 = vmpackc.low %vm966_vm9, %vm965_vm8  ;;  %vm1044_vm9 = vcmask 1031168  }
  0xde   : > { %732 = vmatpush1.bf16.msra.mxu1 %v1642_v34  ;;  %v968_v29 = vsel %vm967_vm10, 65537, %v1674_v22  ;;  %v915_v34 = vld [vmem:[%s324_s15] sm:$0xff] }
  0xdf   : > { %733 = vmatprep.subr.bf16.mxu1 %v1647_v39  ;;  %v1902_v30 = vrot.slane %v968_v29, %v975_v18  ;;  %v1904_v31 = vrot.slane %v968_v29, %v951_v19  ;;  %v917_v36 = vcombine.high %v915_v34, %v915_v34  ;;  %v919_v39 = vpack.c.bf16 %v915_v34, %v915_v34 }
  0xe0   : > { %1584 = vmatmul.mubr.msk.bf16.vlgmr.msra.gmra.mxu0 %vm342_vm2, %v1509_v37 }
  0xe1   : > { %1588 = vmatpush3.bf16.msra.mxu0 %v1763_v6  ;;  %1589 = vmatprep.mubr.msk.bf16.mxu0 %vm1673_vm0, %v1672_v0  ;;  %vm1240_vm0 = vcmask 277504  }
  0xe2   : > { %870 = vmatprep.subr.bf16.mxu0 %v1650_v40  ;;  %734 = vmatpush1.bf16.msra.mxu1 %v1645_v41  ;;  %v909_v41 = vpop.permute.xlu0 %908 }
  0xe3   : > { %735 = vmatprep.subr.bf16.mxu1 %v1653_v43 }
  0xe6   : > { %736 = vmatpush1.bf16.msra.mxu1 %v1651_v45 }
  0xe8   : > { %1590 = vmatmul.mubr.msk.bf16.vlgmr.msra.gmra.mxu0 %vm342_vm2, %v1528_v38 }
  0xe9   : > { %894 = vmatprep.mubr.bf16.mxu0 %v1674_v22  ;;  %871 = vmatpush1.bf16.msra.mxu0 %v1648_v42 }
  0xea   : > { %872 = vmatprep.subr.bf16.mxu0 %v1656_v44  ;;  %v920_v44 = vpack.c.bf16 %v917_v36, %v917_v36 }
  0xed   : > { %873 = vmatpush1.bf16.msra.mxu0 %v1654_v46 }
  0xee   : > { %874 = vmatprep.subr.bf16.mxu0 %v1659_v47 }
  0xf1   : > { %875 = vmatpush1.bf16.msra.mxu0 %v1657_v48  ;;  %v923_v48 = vrot.slane %v919_v39, 6 }
  0xf2   : > { %876 = vmatprep.subr.bf16.mxu0 %v1662_v49 }
  0xf5   : > { %877 = vmatpush1.bf16.msra.mxu0 %v1660_v50 }
 0x198   : > { %v532_v52 = vpop.f32.mrf.mxu0  ;;  %v616_v53 = vpop.f32.mrf.mxu1 }
 0x199   : > { %v1888_v54 = vadd.f32 %v616_v53, %v532_v52  ;;  %v924_v52 = vrot.slane %v920_v44, 6 }
 0x19a   : > { %v534_v55 = vpop.f32.mrf.mxu0  ;;  %v618_v56 = vpop.f32.mrf.mxu1 }
 0x19b   : > { %v1890_v57 = vadd.f32 %v618_v56, %v534_v55 }
 0x19c   : > { %v536_v58 = vpop.f32.mrf.mxu0  ;;  %v620_v59 = vpop.f32.mrf.mxu1 }
 0x19d   : > { %v1070_v58 = vpop.permute.xlu0 %1069 }
 0x19e   : > { %v537_v60 = vpop.f32.mrf.mxu0  ;;  %v621_v61 = vpop.f32.mrf.mxu1  ;;  %vm1075_vm12 = vcmp.ne.s16.totalorder %v1070_v58, 0 }
 0x1a0   : > { %v662_v62 = vpop.f32.mrf.mxu0 }
 0x1a1   : > { %v668_v63 = vpack.c.bf16 %v662_v62, %v662_v62 }
 0x1a2   : > { %v1585_v0 = vpop.f32.mrf.mxu0 }
 0x1a3   : > { %1527 = vmatmul.mubr.msk.bf16.vlgmr.msra.gmra.mxu1 %vm494_vm3, %v668_v63 }
 0x1a4   : > { %v665_v1 = vpop.f32.mrf.mxu0  ;;  %1165 = vmatprep.mubr.bf16.mxu1 %v1674_v22 }
 0x1a6   : > { %v1586_v2 = vpop.f32.mrf.mxu0 }
 0x1a8   : > { %v803_v3 = vpop.f32.mrf.mxu0 }
 0x1a9   : > { %v809_v4 = vpack.c.bf16 %v803_v3, %v803_v3 }
 0x1aa   : > { %v1591_v5 = vpop.f32.mrf.mxu0 }
 0x1ab   : > { %1546 = vmatmul.mubr.msk.bf16.vlgmr.msra.gmra.mxu0 %vm494_vm3, %v809_v4 }
 0x1ac   : > { %v806_v6 = vpop.f32.mrf.mxu0  ;;  %1330 = vmatprep.mubr.bf16.mxu0 %v1674_v22 }
 0x1ae   : > { %v1592_v7 = vpop.f32.mrf.mxu0 }
 0x263   : > { %v755_v32 = vpop.f32.mrf.mxu1 }
 0x264   : > { %v762_v38 = vadd.f32 %v755_v32, %v1888_v54 }
 0x265   : > { %v757_v33 = vpop.f32.mrf.mxu1 }
 0x266   : > { %v763_v42 = vadd.f32 %v757_v33, %v1890_v57  ;;  %v1072_v57 = vpop.permute.xlu1 %1071 }
 0x267   : > { %v759_v35 = vpop.f32.mrf.mxu1  ;;  %v1074_v0 = vsel %vm1073_vm13, %v1070_v58, %v1072_v57  ;;  %vm1077_vm2 = vcmp.ne.s16.totalorder %v1072_v57, 0  ;;  %vm1047_vm13 = vcmask 1043456  }
 0x268   : > { %vm1076_vm15 = vcmp.ne.s16.totalorder %v1074_v0, 0 }
 0x269   : > { %v760_v37 = vpop.f32.mrf.mxu1 }
 0x26b   : > { %v896_v40 = vpop.f32.mrf.mxu0 }
 0x26c   : > { %v903_v43 = vadd.f32 %v896_v40, %v762_v38 }
 0x26d   : > { %v898_v45 = vpop.f32.mrf.mxu0 }
 0x26e   : > { %v911_v46 = vadd.f32 %v909_v41, %v903_v43  ;;  %v904_v47 = vadd.f32 %v898_v45, %v763_v42 }
 0x26f   : > { %v900_v49 = vpop.f32.mrf.mxu0 }
 0x270   : > { %v913_v50 = vpack.c.bf16 %v911_v46, %v911_v46  ;;  %v912_v51 = vadd.f32 %v909_v41, %v904_v47 }
 0x271   : > { %v901_v53 = vpop.f32.mrf.mxu0 }
 0x272   : > { %v914_v55 = vpack.c.bf16 %v912_v51, %v912_v51  ;;  %v927_v56 = vsel %vm346_vm1, %v913_v50, %v923_v48 }
 0x273   : > { %933 = vrot.lane.b32.xlu1 %v927_v56, %s1676_s28 }
 0x274   : > { %v930_v54 = vsel %vm346_vm1, %v914_v55, %v924_v52  ;;  %vm1061_vm1 = vcmask 130048  }
 0x275   : > { %935 = vrot.lane.b32.xlu0 %v930_v54, %s1676_s28  ;;  %s333_s28 = scalar_lea.vmem %s2028_s8, %s1747_s29 }
 0x277   : > { %1236 = vrot.lane.b32.xlu1 %v1004_v23, %s1677_s16 }
 0x279   : > { %1238 = vrot.lane.b32.xlu0 %v1008_v21, %s1677_s16 }
 0x27b   : > { %1059 = vrot.lane.b32.xlu1 %v1902_v30, %s1678_s17 }
 0x27d   : > { %1057 = vrot.lane.b32.xlu0 %v1904_v31, %s1678_s17 }
 0x27f   : > { %1009 = vrot.lane.b32.xlu1 %v1004_v23, %s1679_s18 }
 0x281   : > { %1011 = vrot.lane.b32.xlu0 %v1008_v21, %s1679_s18 }
 0x2e5   : > { %v934_v59 = vpop.permute.xlu1 %933 }
 0x2e6   : > { %v1917_v60 = vsel %vm937_vm11, 0, %v934_v59 }
 0x2e7   : > { %v936_v61 = vpop.permute.xlu0 %935  ;;  %v1078_v62 = vsel %vm1075_vm12, %v1917_v60, 0  ;;  %v1023_v63 = vrot.slane %v1917_v60, 4  ;;  %vm1032_vm12 = vcmask 1039360  }
 0x2e8   : > { %1084 = vrot.lane.b32.xlu1 %v1078_v62, %s1680_s19  ;;  %v1923_v1 = vsel %vm937_vm11, %v934_v59, %v936_v61  ;;  %v1927_v5 = vsel %vm937_vm11, %v936_v61, 0 }
 0x2e9   : > { %v1237_v2 = vpop.permute.xlu1 %1236  ;;  %1026 = vrot.lane.b32.xlu0 %v1023_v63, %s1681_s20  ;;  %v1079_v6 = vsel %vm1076_vm15, %v1923_v1, 0  ;;  %v1080_v10 = vsel %vm1077_vm2, %v1927_v5, 0  ;;  %v1024_v11 = vrot.slane %v1923_v1, 4  ;;  %v1025_v13 = vrot.slane %v1927_v5, 4 }
 0x2ea   : > { %vm1242_vm14 = vcmp.ne.s16.totalorder %v1237_v2, 0  ;;  %vm1228_vm15 = vcmask 261120  }
 0x2eb   : > { %v1239_v3 = vpop.permute.xlu0 %1238  ;;  %v1245_v4 = vsel %vm1242_vm14, %v1917_v60, 0 }
 0x2ec   : > { %1251 = vrot.lane.b32.xlu1 %v1245_v4, %s1680_s19  ;;  %v1241_v7 = vsel %vm1240_vm0, %v1237_v2, %v1239_v3  ;;  %vm1244_vm4 = vcmp.ne.s16.totalorder %v1239_v3, 0 }
 0x2ed   : > { %1086 = vrot.lane.b32.xlu0 %v1079_v6, %s1680_s19  ;;  %v1060_v8 = vpop.permute.xlu1 %1059  ;;  %vm1243_vm3 = vcmp.ne.s16.totalorder %v1241_v7, 0  ;;  %v1247_v17 = vsel %vm1244_vm4, %v1927_v5, 0  ;;  %vm1123_vm4 = vcmask 195584  }
 0x2ee   : > { %v1246_v14 = vsel %vm1243_vm3, %v1923_v1, 0  ;;  %vm1065_vm11 = vcmp.ne.s16.totalorder %v1060_v8, 0  ;;  %vm1116_vm3 = vcmask 916480  }
 0x2ef   : > { %v1058_v9 = vpop.permute.xlu0 %1057  ;;  %v1068_v38 = vsel %vm1065_vm11, %v1927_v5, 0 }
 0x2f0   : > { %v1062_v12 = vsel %vm1061_vm1, %v1058_v9, %v1060_v8  ;;  %1088 = vrot.lane.b32.xlu1 %v1080_v10, %s1680_s19  ;;  %vm1063_vm14 = vcmp.ne.s16.totalorder %v1058_v9, 0  ;;  %v1547_v10 = vld [vmem:[%s2026_s6 + $0x2] sm:$0x3] }
 0x2f1   : > { %1028 = vrot.lane.b32.xlu0 %v1024_v11, %s1681_s20  ;;  %v1010_v15 = vpop.permute.xlu1 %1009  ;;  %vm1064_vm10 = vcmp.ne.s16.totalorder %v1062_v12, 0  ;;  %v1066_v42 = vsel %vm1063_vm14, %v1917_v60, 0 }
 0x2f2   : > { %vm1015_vm6 = vcmp.ne.s16.totalorder %v1010_v15, 0  ;;  %v1067_v34 = vsel %vm1064_vm10, %v1923_v1, 0 }
 0x2f3   : > { %v1012_v16 = vpop.permute.xlu0 %1011  ;;  %v1018_v19 = vsel %vm1015_vm6, %v1917_v60, 0  ;;  %vm1282_vm6 = vcmask 785408  }
 0x2f4   : > { %1030 = vrot.lane.b32.xlu1 %v1025_v13, %s1681_s20  ;;  %v1014_v18 = vsel %vm1013_vm5, %v1010_v15, %v1012_v16  ;;  %vm1017_vm8 = vcmp.ne.s16.totalorder %v1012_v16, 0  ;;  %vm978_vm5 = vcmp.ne.s16.totalorder %v1902_v30, 0 }
 0x2f5   : > { %1253 = vrot.lane.b32.xlu0 %v1246_v14, %s1680_s19  ;;  %vm1016_vm7 = vcmp.ne.s16.totalorder %v1014_v18, 0  ;;  %v1020_v21 = vsel %vm1017_vm8, %v1927_v5, 0  ;;  %v980_v13 = vsel %vm978_vm5, %v1923_v1, 0  ;;  %vm1367_vm8 = vcmask 7168  }
 0x2f6   : > { %v1019_v20 = vsel %vm1016_vm7, %v1923_v1, 0  ;;  %vm977_vm7 = vcmp.ne.s16.totalorder %v1904_v31, 0 }
 0x2f8   : > { %1255 = vrot.lane.b32.xlu1 %v1247_v17, %s1680_s19  ;;  %v979_v17 = vsel %vm977_vm7, %v1917_v60, 0 }
 0x2f9   : > { %1224 = vrot.lane.b32.xlu0 %v1904_v31, %s1682_s21 }
 0x2fc   : > { %1226 = vrot.lane.b32.xlu1 %v1902_v30, %s1682_s21 }
 0x2fd   : > { %1038 = vrot.lane.b32.xlu0 %v1018_v19, %s1680_s19 }
 0x300   : > { %1040 = vrot.lane.b32.xlu1 %v1019_v20, %s1680_s19 }
 0x301   : > { %1042 = vrot.lane.b32.xlu0 %v1020_v21, %s1680_s19 }
 0x35a   : > { %v1085_v23 = vpop.permute.xlu1 %1084 }
 0x35b   : > { %v1027_v24 = vpop.permute.xlu0 %1026 }
 0x35e   : > { %v1252_v25 = vpop.permute.xlu1 %1251 }
 0x35f   : > { %v1087_v26 = vpop.permute.xlu0 %1086 }
 0x360   : > { %v1090_v33 = vsel %vm1044_vm9, %v1085_v23, %v1087_v26  ;;  %v1552_v23 = vld [vmem:[%s2026_s6 + $0x4] sm:$0x3] }
 0x362   : > { %v1089_v27 = vpop.permute.xlu1 %1088 }
 0x363   : > { %1114 = vrot.lane.b32.xlu0 %v1089_v27, %s1683_s22  ;;  %v1029_v28 = vpop.permute.xlu0 %1028  ;;  %v1091_v29 = vsel %vm1044_vm9, %v1087_v26, %v1089_v27 }
 0x364   : > { %1112 = vrot.lane.b32.xlu1 %v1091_v29, %s1683_s22  ;;  %v1956_v39 = vsel %vm1032_vm12, %v1027_v24, %v1029_v28 }
 0x365   : > { %v1093_v43 = vsel %vm1047_vm13, %v1066_v42, %v1956_v39 }
 0x366   : > { %v1031_v32 = vpop.permute.xlu1 %1030 }
 0x367   : > { %v1951_v35 = vsel %vm1032_vm12, %v1029_v28, %v1031_v32  ;;  %1110 = vrot.lane.b32.xlu0 %v1090_v33, %s1683_s22  ;;  %v1254_v36 = vpop.permute.xlu0 %1253  ;;  %v1098_v41 = vsel %vm1047_vm13, %v1068_v38, %v1031_v32 }
 0x368   : > { %v1095_v37 = vsel %vm1047_vm13, %v1067_v34, %v1951_v35  ;;  %v1257_v48 = vsel %vm1044_vm9, %v1252_v25, %v1254_v36  ;;  %v1054_v15 = vsel %vm1047_vm13, %v980_v13, %v1951_v35 }
 0x369   : > { %1106 = vrot.lane.b32.xlu1 %v1095_v37, %s1683_s22 }
 0x36a   : > { %v1256_v40 = vpop.permute.xlu1 %1255 }
 0x36b   : > { %1108 = vrot.lane.b32.xlu0 %v1098_v41, %s1683_s22  ;;  %v1225_v44 = vpop.permute.xlu0 %1224  ;;  %v1258_v46 = vsel %vm1044_vm9, %v1254_v36, %v1256_v40 }
 0x36c   : > { %vm1230_vm0 = vcmp.ne.s16.totalorder %v1225_v44, 0 }
 0x36d   : > { %1104 = vrot.lane.b32.xlu1 %v1093_v43, %s1683_s22  ;;  %v1233_v51 = vsel %vm1230_vm0, %v1917_v60, 0 }
 0x36e   : > { %v1227_v45 = vpop.permute.xlu1 %1226  ;;  %v1260_v53 = vsel %vm1047_vm13, %v1233_v51, %v1956_v39 }
 0x36f   : > { %v1229_v47 = vsel %vm1228_vm15, %v1225_v44, %v1227_v45  ;;  %1278 = vrot.lane.b32.xlu0 %v1258_v46, %s1684_s23  ;;  %vm1232_vm2 = vcmp.ne.s16.totalorder %v1227_v45, 0  ;;  %v1039_v56 = vpop.permute.xlu0 %1038 }
 0x370   : > { %vm1231_vm1 = vcmp.ne.s16.totalorder %v1229_v47, 0  ;;  %v1235_v52 = vsel %vm1232_vm2, %v1927_v5, 0 }
 0x371   : > { %v1234_v49 = vsel %vm1231_vm1, %v1923_v1, 0  ;;  %1276 = vrot.lane.b32.xlu1 %v1257_v48, %s1684_s23  ;;  %v1264_v55 = vsel %vm1047_vm13, %v1235_v52, %v1031_v32  ;;  %v1050_v1 = vsel %vm1047_vm13, %v979_v17, %v1956_v39 }
 0x372   : > { %v1262_v50 = vsel %vm1047_vm13, %v1234_v49, %v1951_v35  ;;  %v1041_v57 = vpop.permute.xlu1 %1040 }
 0x373   : > { %1272 = vrot.lane.b32.xlu0 %v1262_v50, %s1684_s23  ;;  %v1043_v54 = vpop.permute.xlu0 %1042  ;;  %v1045_v7 = vsel %vm1044_vm9, %v1039_v56, %v1041_v57 }
 0x374   : > { %v1046_v8 = vsel %vm1044_vm9, %v1041_v57, %v1043_v54  ;;  %v1178_v12 = vsel %vm1047_vm13, %v1045_v7, 0  ;;  %vm1369_vm9 = vcmask 11264  }
 0x375   : > { %1280 = vrot.lane.b32.xlu1 %v1256_v40, %s1684_s23 }
 0x377   : > { %1270 = vrot.lane.b32.xlu0 %v1260_v53, %s1684_s23 }
 0x379   : > { %1274 = vrot.lane.b32.xlu1 %v1264_v55, %s1684_s23 }
 0x3d5   : > { %v1115_v58 = vpop.permute.xlu0 %1114 }
 0x3d6   : > { %v1113_v59 = vpop.permute.xlu1 %1112 }
 0x3d7   : > { %v1120_v61 = vsel %vm1116_vm3, %v1113_v59, %v1115_v58 }
 0x3d8   : > { %1548 = vmatprep.subr.msk.bf16.mxu1 %vm1047_vm13, %v1120_v61 }
 0x3d9   : > { %v1111_v62 = vpop.permute.xlu0 %1110 }
 0x3da   : > { %v1119_v63 = vsel %vm1116_vm3, %v1111_v62, %v1113_v59 }
 0x3db   : > { %v1128_v0 = vsel %vm1047_vm13, %v1119_v63, 0  ;;  %v1107_v2 = vpop.permute.xlu1 %1106 }
 0x3dc   : > { %1146 = vmatpush1.bf16.msra.mxu1 %v1128_v0 }
 0x3dd   : > { %v1109_v3 = vpop.permute.xlu0 %1108 }
 0x3de   : > { %v1118_v4 = vsel %vm1116_vm3, %v1107_v2, %v1109_v3 }
 0x3df   : > { %v1105_v5 = vpop.permute.xlu1 %1104  ;;  %1147 = vmatprep.subr.bf16.mxu1 %v1118_v4 }
 0x3e0   : > { %v1117_v6 = vsel %vm1116_vm3, %v1105_v5, %v1107_v2 }
 0x3e1   : > { %1148 = vmatpush1.bf16.msra.mxu1 %v1117_v6  ;;  %v1279_v9 = vpop.permute.xlu0 %1278 }
 0x3e2   : > { %1550 = vmatprep.subr.msk.bf16.mxu1 %vm1047_vm13, %v1046_v8 }
 0x3e3   : > { %v1277_v11 = vpop.permute.xlu1 %1276 }
 0x3e4   : > { %1549 = vmatmul.mubr.msk.bf16.vlgmr.msra.gmra.mxu1 %vm1123_vm4, %v1547_v10  ;;  %v1285_v30 = vsel %vm1282_vm6, %v1277_v11, %v1279_v9 }
 0x3e5   : > { %1196 = vmatpush1.bf16.msra.mxu1 %v1178_v12  ;;  %v1273_v14 = vpop.permute.xlu0 %1272  ;;  %1215 = vmatprep.mubr.bf16.mxu1 %v1674_v22  ;;  %v1293_v31 = vsel %vm1047_vm13, %v1285_v30, 0  ;;  %v1056_v22 = vld [vmem:[%s2026_s6] sm:$0x3] }
 0x3e6   : > { %1197 = vmatprep.subr.bf16.mxu1 %v1054_v15 }
 0x3e7   : > { %v1281_v16 = vpop.permute.xlu1 %1280 }
 0x3e8   : > { %v1286_v18 = vsel %vm1282_vm6, %v1279_v9, %v1281_v16 }
 0x3e9   : > { %1198 = vmatpush1.bf16.msra.mxu1 %v1050_v1  ;;  %1553 = vmatprep.subr.msk.bf16.mxu0 %vm1047_vm13, %v1286_v18  ;;  %v1271_v19 = vpop.permute.xlu0 %1270 }
 0x3ea   : > { %1311 = vmatpush1.bf16.msra.mxu0 %v1293_v31  ;;  %v1283_v21 = vsel %vm1282_vm6, %v1271_v19, %v1273_v14 }
 0x3eb   : > { %v1275_v20 = vpop.permute.xlu1 %1274 }
 0x3ec   : > { %1551 = vmatmul.mubr.msk.bf16.vlgmr.msra.gmra.mxu1 %vm1123_vm4, %v1056_v22  ;;  %v1284_v60 = vsel %vm1282_vm6, %v1273_v14, %v1275_v20 }
 0x3ed   : > { %1312 = vmatprep.subr.bf16.mxu0 %v1284_v60 }
 0x3ee   : > { %1313 = vmatpush1.bf16.msra.mxu0 %v1283_v21 }
 0x3f1   : > { %1554 = vmatmul.mubr.msk.bf16.vlgmr.msra.gmra.mxu0 %vm1123_vm4, %v1552_v23 }
 0x4a4   : > { %v1167_v24 = vpop.f32.mrf.mxu1 }
 0x4a6   : > { %v1169_v25 = vpop.f32.mrf.mxu1 }
 0x4a8   : > { %v1171_v26 = vpop.f32.mrf.mxu1 }
 0x4aa   : > { %v1172_v27 = vpop.f32.mrf.mxu1 }
 0x4ac   : > { %v1217_v28 = vpop.f32.mrf.mxu1 }
 0x4ad   : > { %v1218_v32 = vadd.f32 %v1217_v28, %v1167_v24 }
 0x4ae   : > { %v1219_v29 = vpop.f32.mrf.mxu1 }
 0x4af   : > { %v1220_v35 = vadd.f32 %v1219_v29, %v1169_v25 }
 0x4b0   : > { %v1221_v33 = vpop.f32.mrf.mxu1 }
 0x4b1   : > { %v1332_v34 = vpop.f32.mrf.mxu0 }
 0x4b2   : > { %v1339_v36 = vadd.f32 %v1332_v34, %v1218_v32  ;;  %v1222_v37 = vpop.f32.mrf.mxu1 }
 0x4b3   : > { %v1334_v38 = vpop.f32.mrf.mxu0 }
 0x4b4   : > { %v1340_v39 = vadd.f32 %v1334_v38, %v1220_v35  ;;  %v1360_v40 = vmul.f32 %v1339_v36, %v1339_v36  ;;  %v1355_v43 = vsel %vm1047_vm13, %v1339_v36, 0.0 }
 0x4b5   : > { %v1336_v41 = vpop.f32.mrf.mxu0 }
 0x4b6   : > { %v1555_v42 = vpack.c.bf16 %v1340_v39, %v1339_v36  ;;  %v1356_v44 = vsel %vm1047_vm13, %v1340_v39, 0.0  ;;  %v1361_v45 = vmul.f32 %v1340_v39, %v1340_v39  ;;  %v1362_v48 = vsel %vm1047_vm13, %v1360_v40, 0.0 }
 0x4b7   : > { %v1337_v46 = vpop.f32.mrf.mxu0  ;;  %v1357_v47 = vadd.f32 %v1356_v44, %v1355_v43 }
 0x4b8   : > { %1556 = vst.sshfl [vmem:[%s329_s13] sm:$0x33 pattern:$0x76325410] %v1555_v42  ;;  %v1363_v49 = vsel %vm1047_vm13, %v1361_v45, 0.0 }
 0x4b9   : > { %1358 = vadd.xlane.f32.xlu1 %v1357_v47  ;;  %v1364_v50 = vadd.f32 %v1363_v49, %v1362_v48 }
 0x4bb   : > { %1365 = vadd.xlane.f32.xlu0 %v1364_v50 }
 0x542   : > { %v1359_v51 = vpop.xlane.xlu1 %1358 }
 0x544   : > { %v1366_v52 = vpop.xlane.xlu0 %1365 }
 0x545   : > { %v1368_v53 = vsel %vm1367_vm8, %v1359_v51, %v1366_v52 }
 0x546   : > { %1370 = vst.msk [vmem:[%s333_s28] sm:$0xf] %vm1369_vm9, %v1368_v53 }
 0x547 PF: > { %s19_s27 = sadd.s32 1, %s1670_s27  }
 0x548   : > { %p16_p4 = scmp.ge.s32.totalorder %s19_s27, 4  }
 0x54a   :  { %18 = sbr.rel (!%p16_p4) target bundleno = 1 (0x1), region = 101 }

</bundles_post_ra>
